<compile_context>
chip_gen: v7x
topology: tpu7x:2x2x1
jax: 0.10.0
libtpu: 0.0.40
codegen_flags: <defaults>
</compile_context>

<pallas_src>
import math
import functools

import jax
import jax.numpy as jnp
from jax import lax
from jax.experimental import pallas as pl
from jax.experimental.pallas import tpu as pltpu


# ------------------------------ small helpers --------------------------------

def _round_up(x, m):
    return ((x + m - 1) // m) * m


@functools.lru_cache(maxsize=None)
def _vmem_limit_bytes():
    """Generation-dependent scoped-VMEM limit: 3/4 of physical capacity.

    v5e/v6e: 128 MiB -> 96 MiB; v7x: 64 MiB -> 48 MiB (headroom for the
    compiler's internal scratch and the double-buffered pipeline).
    """
    cap = 128 * 1024 * 1024
    try:
        cap = int(pltpu.get_tpu_info().vmem_capacity_bytes)
    except Exception:
        pass
    return (cap * 3) // 4


def _pick_tile(dim, cap, multiples=(256, 128)):
    """Largest tile <= cap equal to dim or an aligned divisor of dim.

    256-aligned tiles are preferred so GEMM tiles match the 2x256^2 MXU on
    v6e/v7x (a 384-wide tile would waste half an MXU pass).
    """
    if dim <= cap:
        return dim
    for m in multiples:
        t = (cap // m) * m
        while t >= m:
            if dim % t == 0:
                return t
            t -= m
    # TODO(synk): truly unfriendly feature sizes (no 128-aligned divisor) fall
    # back to the full extent; zero-pad Fin/Fout of the weights if this ever
    # becomes a VMEM problem (bounded by the model width, so acceptable here).
    return dim


# ------------------------------ linear (GEMM) --------------------------------

def _linear_kernel(x_ref, w_ref, b_ref, o_ref, acc_ref, *, mxu_dtype):
    # x: (Tm, Tk)  w: (Tk, Tn)  b: (1, Tn)  o: (Tm, Tn)  acc: f32 (Tm, Tn)
    k = pl.program_id(2)

    @pl.when(k == 0)
    def _init():
        acc_ref[...] = jnp.zeros_like(acc_ref[...])

    # Optional bf16 MXU feed (f32 x f32 runs at a fraction of bf16 throughput);
    # accumulation stays f32.
    acc_ref[...] += jnp.dot(x_ref[...].astype(mxu_dtype),
                            w_ref[...].astype(mxu_dtype),
                            preferred_element_type=jnp.float32)

    @pl.when(k == pl.num_programs(2) - 1)
    def _finalize():
        o_ref[...] = (acc_ref[...] + b_ref[...].astype(jnp.float32)).astype(o_ref.dtype)


def linear(x2d, w, b, *, out_dtype=None, mxu_dtype=None, tm=512, tn=512, tk=512):
    """y = x2d @ w + b.  x2d: (M, Fin), w: (Fin, Fout) (pre-transposed), b: (Fout,)."""
    M, Fin = x2d.shape
    Fout = w.shape[1]
    out_dtype = out_dtype or x2d.dtype
    mxu_dtype = mxu_dtype or x2d.dtype

    Tn = _pick_tile(Fout, tn)
    Tk = _pick_tile(Fin, tk)
    Tm = min(tm, _round_up(M, 8))
    # v7x megacore: make sure the "parallel" axes expose >= 2 grid tiles.
    if pl.cdiv(M, Tm) * pl.cdiv(Fout, Tn) < 2 and Tm > 8:
        Tm = _round_up(pl.cdiv(Tm, 2), 8)
    Mp = _round_up(M, Tm)
    x_in = x2d if Mp == M else jnp.pad(x2d, ((0, Mp - M), (0, 0)))

    grid = (Mp // Tm, Fout // Tn, Fin // Tk)
    flops = 2 * Mp * Fin * Fout
    bytes_accessed = (Mp * Fin * x2d.dtype.itemsize
                      + grid[0] * Fin * Fout * w.dtype.itemsize      # W re-read per M tile
                      + Fout * b.dtype.itemsize
                      + Mp * Fout * jnp.dtype(out_dtype).itemsize)

    out = pl.pallas_call(
        functools.partial(_linear_kernel, mxu_dtype=mxu_dtype),
        out_shape=jax.ShapeDtypeStruct((Mp, Fout), out_dtype),
        grid_spec=pltpu.PrefetchScalarGridSpec(
            num_scalar_prefetch=0,
            grid=grid,
            in_specs=[
                pl.BlockSpec((Tm, Tk), lambda i, j, k: (i, k)),
                pl.BlockSpec((Tk, Tn), lambda i, j, k: (k, j)),
                pl.BlockSpec((1, Tn), lambda i, j, k: (0, j)),
            ],
            out_specs=pl.BlockSpec((Tm, Tn), lambda i, j, k: (i, j)),
            scratch_shapes=[pltpu.VMEM((Tm, Tn), jnp.float32)],
        ),
        compiler_params=pltpu.CompilerParams(
            dimension_semantics=("parallel", "parallel", "arbitrary"),
            vmem_limit_bytes=_vmem_limit_bytes()),
        cost_estimate=pl.CostEstimate(flops=flops, transcendentals=0,
                                      bytes_accessed=int(bytes_accessed)),
    )(x_in, w, b.reshape(1, Fout))
    return out if Mp == M else out[:M]


# --------------------------- flash attention (packed) -------------------------

def _mha_attention_kernel(q_ref, k_ref, v_ref, *rest,
                          head_num, dim_head, scale, with_bias, mxu_dtype):
    # q_ref: (1, Tq, F)   k_ref/v_ref: (1, Tkv, F)
    # optional bias_ref: (1, Tq, Tkv) or (1, 1, Tkv) additive (0 / -1e9)
    # o_ref: (1, Tq, F)   scratch: m,l (Tq, H) f32, acc (Tq, F) f32
    if with_bias:
        bias_ref = rest[0]
        o_ref, m_ref, l_ref, acc_ref = rest[1:]
    else:
        o_ref, m_ref, l_ref, acc_ref = rest

    kv_idx = pl.program_id(2)

    @pl.when(kv_idx == 0)
    def _init():
        m_ref[...] = jnp.full_like(m_ref[...], -jnp.inf)
        l_ref[...] = jnp.zeros_like(l_ref[...])
        acc_ref[...] = jnp.zeros_like(acc_ref[...])

    # Load once per grid step; softmax scale hoisted out of the head loop
    # (one Tq x F multiply instead of H Tq x Tkv multiplies).
    q_all = (q_ref[0] * scale).astype(mxu_dtype)       # (Tq, F)
    k_all = k_ref[0].astype(mxu_dtype)                 # (Tkv, F)
    v_all = v_ref[0].astype(mxu_dtype)                 # (Tkv, F)
    if with_bias:
        bias = bias_ref[0].astype(jnp.float32)         # (Tq, Tkv) or (1, Tkv)

    # Single dense loads of the running state; per-head updates stay in
    # registers and are written back with one dense store each (no masked
    # partial-vreg RMWs inside the kv loop).
    m_prev_all = m_ref[...]                            # (Tq, H)
    l_prev_all = l_ref[...]                            # (Tq, H)
    acc_prev_all = acc_ref[...]                        # (Tq, F)

    m_parts, l_parts, acc_parts = [], [], []
    for h in range(head_num):                          # static loop -> static slices
        cols = slice(h * dim_head, (h + 1) * dim_head)
        q = q_all[:, cols]                             # (Tq, Dh)
        k = k_all[:, cols]                             # (Tkv, Dh)
        v = v_all[:, cols]                             # (Tkv, Dh)

        # QK^T contracting the last dims of both operands (no k.T materialized).
        s = lax.dot_general(q, k, dimension_numbers=(((1,), (1,)), ((), ())),
                            preferred_element_type=jnp.float32)       # (Tq, Tkv)
        if with_bias:
            s = s + bias                               # additive 0 / -1e9 bias

        m_prev = m_prev_all[:, h:h + 1]                                # (Tq, 1)
        m_new = jnp.maximum(m_prev, jnp.max(s, axis=-1, keepdims=True))
        alpha = jnp.exp(m_prev - m_new)
        # TODO(synk): on v6e/v7x a bf16 exp would ~2x EUP throughput (the inner
        # loop is EUP-bound for Dh<=128) but loosens online-softmax numerics;
        # kept f32 here (also required on v5e).
        p = jnp.exp(s - m_new)
        l_parts.append(alpha * l_prev_all[:, h:h + 1]
                       + jnp.sum(p, axis=-1, keepdims=True))
        pv = lax.dot_general(p.astype(mxu_dtype), v,
                             dimension_numbers=(((1,), (0,)), ((), ())),
                             preferred_element_type=jnp.float32)       # (Tq, Dh)
        acc_parts.append(alpha * acc_prev_all[:, cols] + pv)
        m_parts.append(m_new)
        # TODO(synk): dropout on attention weights omitted (eval-mode identity).

    m_ref[...] = jnp.concatenate(m_parts, axis=1)          # one (Tq, H) store
    l_ref[...] = jnp.concatenate(l_parts, axis=1)          # one (Tq, H) store
    acc_ref[...] = jnp.concatenate(acc_parts, axis=1)      # lane-dense (Tq, F) store

    @pl.when(kv_idx == pl.num_programs(2) - 1)
    def _finalize():
        # EUP approximate reciprocal + one Newton step (finalize-only) avoids a
        # VALU division while keeping ~f32 accuracy.
        l = l_ref[...]                                     # (Tq, H)
        r = pl.reciprocal(l, approx=True)
        r = r * (2.0 - l * r)
        acc = acc_ref[...]                                 # (Tq, F)
        parts = [acc[:, h * dim_head:(h + 1) * dim_head] * r[:, h:h + 1]
                 for h in range(head_num)]
        o_ref[0] = jnp.concatenate(parts, axis=1).astype(o_ref.dtype)  # dense store


def mha_attention(q_up, k_up, v_up, mask, *, head_num, mxu_dtype=None,
                  tq=512, tkv=256):
    """Packed-layout multi-head flash attention.  q/k/v: (B, S, F=H*Dh) -> (B, Sq, F)."""
    B, Sq, F = q_up.shape
    Skv = k_up.shape[1]
    dim_head = F // head_num
    scale = 1.0 / math.sqrt(dim_head)
    mxu_dtype = mxu_dtype or q_up.dtype
    itemsize = jnp.dtype(q_up.dtype).itemsize

    # ---- tile selection: Tq multiple-of-8 or full extent, Tkv multiple-of-128
    #      or full extent (needed by the bias block's lane dim) ----
    Tq = Sq if Sq <= tq else tq
    Tkv = Skv if Skv <= tkv else tkv
    # v7x megacore: expose at least two "parallel" grid tiles when possible.
    if B * pl.cdiv(Sq, Tq) < 2 and Sq > 8:
        Tq = _round_up(pl.cdiv(Sq, 2), 8)

    # VMEM-aware shrink (v7x has 64 MiB/TC; v5e/v6e 128 MiB).
    budget = (_vmem_limit_bytes() * 9) // 10

    def _footprint(tq_, tkv_):
        dbl = 2 * (2 * tq_ * F + 2 * tkv_ * F) * itemsize   # q,k,v,out double-buffered
        dbl += 2 * tq_ * tkv_ * 2                           # bf16 bias (worst case)
        return dbl + tq_ * F * 4 + 2 * tq_ * head_num * 4   # + scratch

    while _footprint(Tq, Tkv) > budget and Tq > 64:
        Tq = _round_up(pl.cdiv(Tq, 2), 8)
    while _footprint(Tq, Tkv) > budget and Tkv > 128:
        Tkv = _round_up(pl.cdiv(Tkv, 2), 128)

    Sq_p, Skv_p = _round_up(Sq, Tq), _round_up(Skv, Tkv)
    pad_q, pad_k = Sq_p - Sq, Skv_p - Skv
    if pad_q:
        q_up = jnp.pad(q_up, ((0, 0), (0, pad_q), (0, 0)))
    if pad_k:
        k_up = jnp.pad(k_up, ((0, 0), (0, pad_k), (0, 0)))
        v_up = jnp.pad(v_up, ((0, 0), (0, pad_k), (0, 0)))

    args = [q_up, k_up, v_up]
    in_specs = [
        pl.BlockSpec((1, Tq, F), lambda b, qi, ki: (b, qi, 0)),
        pl.BlockSpec((1, Tkv, F), lambda b, qi, ki: (b, ki, 0)),
        pl.BlockSpec((1, Tkv, F), lambda b, qi, ki: (b, ki, 0)),
    ]
    with_bias = (mask is not None) or (pad_k > 0)
    bias_bytes = 0
    if mask is not None:
        # Additive bf16 bias (0 / -1e9) built once in the wrapper: removes the
        # per-head compare+select and halves mask DMA traffic vs int32.
        bias = jnp.where(jnp.broadcast_to(mask, (B, Sq, Skv)) == 0,
                         -1e9, 0.0).astype(jnp.bfloat16)
        if pad_q or pad_k:
            bias = jnp.pad(bias, ((0, 0), (0, pad_q), (0, pad_k)),
                           constant_values=-1e9)
        in_specs.append(pl.BlockSpec((1, Tq, Tkv), lambda b, qi, ki: (b, qi, ki)))
        args.append(bias)
        bias_bytes = bias.size * 2
    elif pad_k:
        # Key-padding only: one broadcastable bias row, no (B, Sq, Skv) blow-up.
        col = jnp.arange(Skv_p)
        bias = jnp.where(col < Skv, 0.0, -1e9).astype(jnp.bfloat16).reshape(1, 1, Skv_p)
        in_specs.append(pl.BlockSpec((1, 1, Tkv), lambda b, qi, ki: (0, 0, ki)))
        args.append(bias)
        bias_bytes = B * (Sq_p // Tq) * Skv_p * 2

    grid = (B, Sq_p // Tq, Skv_p // Tkv)
    kern = functools.partial(_mha_attention_kernel, head_num=head_num,
                             dim_head=dim_head, scale=scale,
                             with_bias=with_bias, mxu_dtype=mxu_dtype)

    n_q = Sq_p // Tq
    flops = 4 * B * Sq_p * Skv_p * F
    bytes_accessed = (B * Sq_p * F * itemsize                 # Q read once
                      + 2 * B * n_q * Skv_p * F * itemsize    # K,V re-read per q tile
                      + B * Sq_p * F * itemsize               # output
                      + bias_bytes)

    out = pl.pallas_call(
        kern,
        out_shape=jax.ShapeDtypeStruct((B, Sq_p, F), q_up.dtype),
        grid_spec=pltpu.PrefetchScalarGridSpec(
            num_scalar_prefetch=0,
            grid=grid,
            in_specs=in_specs,
            out_specs=pl.BlockSpec((1, Tq, F), lambda b, qi, ki: (b, qi, 0)),
            scratch_shapes=[
                pltpu.VMEM((Tq, head_num), jnp.float32),   # running max m
                pltpu.VMEM((Tq, head_num), jnp.float32),   # running sum l
                pltpu.VMEM((Tq, F), jnp.float32),          # packed output accumulator
            ],
        ),
        compiler_params=pltpu.CompilerParams(
            dimension_semantics=("parallel", "parallel", "arbitrary"),
            vmem_limit_bytes=_vmem_limit_bytes()),
        cost_estimate=pl.CostEstimate(flops=int(flops),
                                      transcendentals=int(B * Sq_p * Skv_p * head_num),
                                      bytes_accessed=int(bytes_accessed)),
    )(*args)
    return out if pad_q == 0 else out[:, :Sq, :]


# ----------------------------- module-level wrappers ---------------------------

@functools.partial(jax.jit, static_argnames=("head_num", "mxu_dtype"))
def _mha_forward(weights_t, biases, query, key, value, mask, *, head_num, mxu_dtype):
    cd = weights_t[0].dtype
    B, Sq, F = query.shape
    Skv = key.shape[1]
    q2 = query.reshape(B * Sq, F).astype(cd)
    k2 = key.reshape(B * Skv, F).astype(cd)
    v2 = value.reshape(B * Skv, F).astype(cd)

    q_up = linear(q2, weights_t[0], biases[0], mxu_dtype=mxu_dtype).reshape(B, Sq, F)
    k_up = linear(k2, weights_t[1], biases[1], mxu_dtype=mxu_dtype).reshape(B, Skv, F)
    v_up = linear(v2, weights_t[2], biases[2], mxu_dtype=mxu_dtype).reshape(B, Skv, F)

    x = mha_attention(q_up, k_up, v_up, mask, head_num=head_num, mxu_dtype=mxu_dtype)
    return linear(x.reshape(B * Sq, F), weights_t[3], biases[3],
                  mxu_dtype=mxu_dtype).reshape(B, Sq, F)


@functools.partial(jax.jit, static_argnames=("head_num", "mxu_dtype"))
def _mha_forward_self(w_qkv, b_qkv, w_o, b_o, x, mask, *, head_num, mxu_dtype):
    # Self-attention: fused (F, 3F) QKV projection -> the activations are read
    # from HBM once and the grid-step overhead is paid once.
    cd = w_qkv.dtype
    B, S, F = x.shape
    x2 = x.reshape(B * S, F).astype(cd)
    qkv = linear(x2, w_qkv, b_qkv, mxu_dtype=mxu_dtype)          # (B*S, 3F)
    q_up = qkv[:, 0 * F:1 * F].reshape(B, S, F)
    k_up = qkv[:, 1 * F:2 * F].reshape(B, S, F)
    v_up = qkv[:, 2 * F:3 * F].reshape(B, S, F)
    xo = mha_attention(q_up, k_up, v_up, mask, head_num=head_num, mxu_dtype=mxu_dtype)
    return linear(xo.reshape(B * S, F), w_o, b_o, mxu_dtype=mxu_dtype).reshape(B, S, F)


class MultiHeadedAttentionPallas:
    """Pallas re-implementation of the PyTorch MultiHeadedAttention forward (eval mode)."""

    def __init__(self, head_num, feature_size, key, compute_dtype=jnp.float32,
                 mxu_dtype=None):
        assert feature_size % head_num == 0
        self.head_num = head_num
        self.dimension_each_head = feature_size // head_num
        self.feature_size = feature_size
        self.compute_dtype = compute_dtype
        self.mxu_dtype = mxu_dtype
        ks = jax.random.split(key, 8)
        bound = 1.0 / math.sqrt(feature_size)
        self.weights, biases = [], []
        for i in range(4):
            w = jax.random.uniform(ks[2 * i], (feature_size, feature_size),
                                   jnp.float32, -bound, bound)
            b = jax.random.uniform(ks[2 * i + 1], (feature_size,),
                                   jnp.float32, -bound, bound)
            self.weights.append(w)
            biases.append(b)
        # Pre-transposed (Fin, Fout), stored in the compute dtype (bf16 halves
        # weight HBM/VMEM traffic); accumulation stays f32 inside the kernels.
        self.weights_t = tuple(w.T.astype(compute_dtype) for w in self.weights)
        self.biases = tuple(biases)
        # Fused QKV weight/bias for the self-attention fast path.
        self.w_qkv = jnp.concatenate(self.weights_t[:3], axis=1)   # (F, 3F)
        self.b_qkv = jnp.concatenate(self.biases[:3])              # (3F,)

    def __call__(self, query, key, value, mask=None):
        if query is key and key is value:
            return _mha_forward_self(self.w_qkv, self.b_qkv,
                                     self.weights_t[3], self.biases[3],
                                     query, mask, head_num=self.head_num,
                                     mxu_dtype=self.mxu_dtype)
        return _mha_forward(self.weights_t, self.biases, query, key, value, mask,
                            head_num=self.head_num, mxu_dtype=self.mxu_dtype)


# --------------------------------- reference -----------------------------------

def reference_forward(mha, query, key, value, mask=None):
    """Pure-JAX f32 reference matching the PyTorch forward (eval mode)."""
    B = query.shape[0]
    H, Dh = mha.head_num, mha.dimension_each_head

    def lin(x, w, b):
        return x @ w.T + b

    def split_heads(t):
        return t.reshape(B, -1, H, Dh).transpose(0, 2, 1, 3)

    q = split_heads(lin(query, mha.weights[0], mha.biases[0]))
    k = split_heads(lin(key, mha.weights[1], mha.biases[1]))
    v = split_heads(lin(value, mha.weights[2], mha.biases[2]))
    scores = jnp.einsum("bhqd,bhkd->bhqk", q, k) / math.sqrt(Dh)
    if mask is not None:
        scores = jnp.where(mask[:, None, :, :] == 0, -1e9, scores)
    attn = jax.nn.softmax(scores, axis=-1)
    x = jnp.einsum("bhqk,bhkd->bhqd", attn, v)
    x = x.transpose(0, 2, 1, 3).reshape(B, -1, H * Dh)
    return lin(x, mha.weights[3], mha.biases[3])


if __name__ == "__main__":
    B, S, F, H = 2, 8, 32, 4
    root = jax.random.PRNGKey(0)
    k_param, kq, kk, kv, kmask, kx = jax.random.split(root, 6)

    query = jax.random.normal(kq, (B, S, F), jnp.float32)
    key = jax.random.normal(kk, (B, S, F), jnp.float32)
    value = jax.random.normal(kv, (B, S, F), jnp.float32)

    mha = MultiHeadedAttentionPallas(H, F, k_param, compute_dtype=jnp.float32)

    # 1) f32, cross-attention (separate Q/K/V projections), no mask.
    out = jax.block_until_ready(mha(query, key, value, mask=None))
    ref = reference_forward(mha, query, key, value, mask=None)
    assert out.shape == (B, S, F)
    err = float(jnp.max(jnp.abs(out - ref)))
    assert jnp.allclose(out, ref, atol=2e-3, rtol=2e-3), err

    # 2) f32 with mask (PyTorch masked_fill(mask == 0, -1e9) -> additive bias).
    mask = (jax.random.uniform(kmask, (B, S, S)) > 0.3).astype(jnp.int32)
    mask = mask.at[:, :, 0].set(1)     # keep at least one visible key per query row
    out_m = jax.block_until_ready(mha(query, key, value, mask=mask))
    ref_m = reference_forward(mha, query, key, value, mask=mask)
    err_m = float(jnp.max(jnp.abs(out_m - ref_m)))
    assert jnp.allclose(out_m, ref_m, atol=2e-3, rtol=2e-3), err_m

    # 3) self-attention -> fused QKV projection fast path.
    out_s = jax.block_until_ready(mha(query, query, query, mask=mask))
    ref_s = reference_forward(mha, query, query, query, mask=mask)
    err_s = float(jnp.max(jnp.abs(out_s - ref_s)))
    assert jnp.allclose(out_s, ref_s, atol=2e-3, rtol=2e-3), err_s

    # 4) tile-unfriendly sequence lengths (exercises Sq/Skv/M padding + key bias).
    for (Bu, Su) in ((1, 13), (1, 300)):
        qs = jax.random.normal(kx, (Bu, Su, F), jnp.float32)
        out_u = jax.block_until_ready(mha(qs, qs, qs, mask=None))
        ref_u = reference_forward(mha, qs, qs, qs, mask=None)
        assert out_u.shape == (Bu, Su, F)
        err_u = float(jnp.max(jnp.abs(out_u - ref_u)))
        assert jnp.allclose(out_u, ref_u, atol=2e-3, rtol=2e-3), err_u

    # 5) bf16 storage/compute (f32 accumulation & softmax stay inside the kernels).
    mha_bf16 = MultiHeadedAttentionPallas(H, F, k_param, compute_dtype=jnp.bfloat16)
    out_b = jax.block_until_ready(mha_bf16(query, key, value, mask=None))
    assert out_b.dtype == jnp.bfloat16
    err_b = float(jnp.max(jnp.abs(out_b.astype(jnp.float32) - ref)))
    assert jnp.allclose(out_b.astype(jnp.float32), ref, atol=1e-1, rtol=1e-1), err_b

    # 6) f32 storage with bf16 MXU operands (bf16-native MXU, f32 accumulation).
    mha_mxu = MultiHeadedAttentionPallas(H, F, k_param, compute_dtype=jnp.float32,
                                         mxu_dtype=jnp.bfloat16)
    out_x = jax.block_until_ready(mha_mxu(query, key, value, mask=None))
    err_x = float(jnp.max(jnp.abs(out_x - ref)))
    assert jnp.allclose(out_x, ref, atol=1e-1, rtol=1e-1), err_x

    print("KERNEL_OK")
</pallas_src>

<mosaic_0001>
module attributes {stable_mosaic.version = 11 : i64} {
  func.func @_linear_kernel(%arg0: i32, %arg1: i32, %arg2: i32, %arg3: memref<8x32xf32, #tpu.memory_space<vmem>>, %arg4: memref<32x32xf32, #tpu.memory_space<vmem>>, %arg5: memref<1x32xf32, #tpu.memory_space<vmem>>, %arg6: memref<8x32xf32, #tpu.memory_space<vmem>>, %arg7: memref<8x32xf32, #tpu.memory_space<vmem>>) attributes {dimension_semantics = [#tpu.dimension_semantics<parallel>, #tpu.dimension_semantics<parallel>, #tpu.dimension_semantics<arbitrary>], iteration_bounds = array<i64: 2, 1, 1>, scalar_prefetch = 0 : i64, scratch_operands = 1 : i64, tpu.core_type = #tpu.core_type<tc>, window_params = [{transform_indices = @transform_0, window_bounds = array<i64: 8, 32>}, {transform_indices = @transform_1, window_bounds = array<i64: 32, 32>}, {transform_indices = @transform_2, window_bounds = array<i64: 1, 32>}, {transform_indices = @transform_3, window_bounds = array<i64: 8, 32>}]} {
    %c0_i32 = arith.constant 0 : i32
    %0 = arith.cmpi eq, %arg2, %c0_i32 : i32
    %1 = arith.extui %0 : i1 to i32
    %c0_i32_0 = arith.constant 0 : i32
    %2 = arith.cmpi ne, %1, %c0_i32_0 : i32
    scf.if %2 {
      %cst_10 = arith.constant 0.000000e+00 : f32
      %12 = vector.broadcast %cst_10 : f32 to vector<8x32xf32>
      %c0_11 = arith.constant 0 : index
      %c0_12 = arith.constant 0 : index
      %13 = vector.load %arg7[%c0_11, %c0_12] : memref<8x32xf32, #tpu.memory_space<vmem>>, vector<8x32xf32>
      tpu.vector_store %arg7[%c0_11, %c0_12], %12 {strides = array<i32>} : memref<8x32xf32, #tpu.memory_space<vmem>>, vector<8x32xf32>,
    } else {
    }
    %c0 = arith.constant 0 : index
    %c0_1 = arith.constant 0 : index
    %3 = vector.load %arg7[%c0, %c0_1] : memref<8x32xf32, #tpu.memory_space<vmem>>, vector<8x32xf32>
    %c0_2 = arith.constant 0 : index
    %c0_3 = arith.constant 0 : index
    %4 = vector.load %arg3[%c0_2, %c0_3] : memref<8x32xf32, #tpu.memory_space<vmem>>, vector<8x32xf32>
    %c0_4 = arith.constant 0 : index
    %c0_5 = arith.constant 0 : index
    %5 = vector.load %arg4[%c0_4, %c0_5] : memref<32x32xf32, #tpu.memory_space<vmem>>, vector<32x32xf32>
    %cst = arith.constant dense<0.000000e+00> : vector<8x32xf32>
    %6 = tpu.matmul %4, %5, %cst {dimension_numbers = #tpu.dot_dimension_numbers<[1], [0], [0], [1], [0, 0, 1, 1], [], []>} : vector<8x32xf32>, vector<32x32xf32>, vector<8x32xf32> -> vector<8x32xf32>
    %7 = arith.addf %3, %6 : vector<8x32xf32>
    %c0_6 = arith.constant 0 : index
    %c0_7 = arith.constant 0 : index
    %8 = vector.load %arg7[%c0_6, %c0_7] : memref<8x32xf32, #tpu.memory_space<vmem>>, vector<8x32xf32>
    tpu.vector_store %arg7[%c0_6, %c0_7], %7 {strides = array<i32>} : memref<8x32xf32, #tpu.memory_space<vmem>>, vector<8x32xf32>,
    %c0_i32_8 = arith.constant 0 : i32
    %9 = arith.cmpi eq, %arg2, %c0_i32_8 : i32
    %10 = arith.extui %9 : i1 to i32
    %c0_i32_9 = arith.constant 0 : i32
    %11 = arith.cmpi ne, %10, %c0_i32_9 : i32
    scf.if %11 {
      %c0_10 = arith.constant 0 : index
      %c0_11 = arith.constant 0 : index
      %12 = vector.load %arg7[%c0_10, %c0_11] : memref<8x32xf32, #tpu.memory_space<vmem>>, vector<8x32xf32>
      %c0_12 = arith.constant 0 : index
      %c0_13 = arith.constant 0 : index
      %13 = vector.load %arg5[%c0_12, %c0_13] : memref<1x32xf32, #tpu.memory_space<vmem>>, vector<1x32xf32>
      %14 = vector.broadcast %13 : vector<1x32xf32> to vector<8x32xf32>
      %15 = arith.addf %12, %14 : vector<8x32xf32>
      %c0_14 = arith.constant 0 : index
      %c0_15 = arith.constant 0 : index
      %16 = vector.load %arg6[%c0_14, %c0_15] : memref<8x32xf32, #tpu.memory_space<vmem>>, vector<8x32xf32>
      tpu.vector_store %arg6[%c0_14, %c0_15], %15 {strides = array<i32>} : memref<8x32xf32, #tpu.memory_space<vmem>>, vector<8x32xf32>,
    } else {
    }
    return
  }
  func.func @transform_0(%arg0: i32, %arg1: i32, %arg2: i32) -> (i32, i32) {
    %c0_i32 = arith.constant 0 : i32
    return %arg0, %arg2 : i32, i32
  }
  func.func @transform_1(%arg0: i32, %arg1: i32, %arg2: i32) -> (i32, i32) {
    %c0_i32 = arith.constant 0 : i32
    return %arg2, %arg1 : i32, i32
  }
  func.func @transform_2(%arg0: i32, %arg1: i32, %arg2: i32) -> (i32, i32) {
    %c0_i32 = arith.constant 0 : i32
    %c0_i32_0 = arith.constant 0 : i32
    return %c0_i32, %arg1 : i32, i32
  }
  func.func @transform_3(%arg0: i32, %arg1: i32, %arg2: i32) -> (i32, i32) {
    %c0_i32 = arith.constant 0 : i32
    return %arg0, %arg1 : i32, i32
  }
}

module attributes {stable_mosaic.version = 11 : i64} {
  func.func @_mha_attention_kernel(%arg0: i32, %arg1: i32, %arg2: i32, %arg3: memref<1x8x32xf32, #tpu.memory_space<vmem>>, %arg4: memref<1x8x32xf32, #tpu.memory_space<vmem>>, %arg5: memref<1x8x32xf32, #tpu.memory_space<vmem>>, %arg6: memref<1x8x32xf32, #tpu.memory_space<vmem>>, %arg7: memref<8x4xf32, #tpu.memory_space<vmem>>, %arg8: memref<8x4xf32, #tpu.memory_space<vmem>>, %arg9: memref<8x32xf32, #tpu.memory_space<vmem>>) attributes {dimension_semantics = [#tpu.dimension_semantics<parallel>, #tpu.dimension_semantics<parallel>, #tpu.dimension_semantics<arbitrary>], iteration_bounds = array<i64: 2, 1, 1>, scalar_prefetch = 0 : i64, scratch_operands = 3 : i64, tpu.core_type = #tpu.core_type<tc>, window_params = [{transform_indices = @transform_0, window_bounds = array<i64: 1, 8, 32>}, {transform_indices = @transform_1, window_bounds = array<i64: 1, 8, 32>}, {transform_indices = @transform_2, window_bounds = array<i64: 1, 8, 32>}, {transform_indices = @transform_3, window_bounds = array<i64: 1, 8, 32>}]} {
    %c0_i32 = arith.constant 0 : i32
    %0 = arith.cmpi eq, %arg2, %c0_i32 : i32
    %1 = arith.extui %0 : i1 to i32
    %c0_i32_0 = arith.constant 0 : i32
    %2 = arith.cmpi ne, %1, %c0_i32_0 : i32
    scf.if %2 {
      %cst_39 = arith.constant 0xFF800000 : f32
      %115 = vector.broadcast %cst_39 : f32 to vector<8x4xf32>
      %c0_40 = arith.constant 0 : index
      %c0_41 = arith.constant 0 : index
      %116 = vector.load %arg7[%c0_40, %c0_41] : memref<8x4xf32, #tpu.memory_space<vmem>>, vector<8x4xf32>
      tpu.vector_store %arg7[%c0_40, %c0_41], %115 {strides = array<i32>} : memref<8x4xf32, #tpu.memory_space<vmem>>, vector<8x4xf32>,
      %cst_42 = arith.constant 0.000000e+00 : f32
      %117 = vector.broadcast %cst_42 : f32 to vector<8x4xf32>
      %c0_43 = arith.constant 0 : index
      %c0_44 = arith.constant 0 : index
      %118 = vector.load %arg8[%c0_43, %c0_44] : memref<8x4xf32, #tpu.memory_space<vmem>>, vector<8x4xf32>
      tpu.vector_store %arg8[%c0_43, %c0_44], %117 {strides = array<i32>} : memref<8x4xf32, #tpu.memory_space<vmem>>, vector<8x4xf32>,
      %cst_45 = arith.constant 0.000000e+00 : f32
      %119 = vector.broadcast %cst_45 : f32 to vector<8x32xf32>
      %c0_46 = arith.constant 0 : index
      %c0_47 = arith.constant 0 : index
      %120 = vector.load %arg9[%c0_46, %c0_47] : memref<8x32xf32, #tpu.memory_space<vmem>>, vector<8x32xf32>
      tpu.vector_store %arg9[%c0_46, %c0_47], %119 {strides = array<i32>} : memref<8x32xf32, #tpu.memory_space<vmem>>, vector<8x32xf32>,
    } else {
    }
    %c0 = arith.constant 0 : index
    %c0_1 = arith.constant 0 : index
    %c0_2 = arith.constant 0 : index
    %3 = vector.load %arg3[%c0, %c0_1, %c0_2] : memref<1x8x32xf32, #tpu.memory_space<vmem>>, vector<1x8x32xf32>
    %4 = vector.shape_cast %3 : vector<1x8x32xf32> to vector<8x32xf32>
    %cst = arith.constant 0.353553385 : f32
    %5 = vector.broadcast %cst : f32 to vector<8x32xf32>
    %6 = arith.mulf %4, %5 : vector<8x32xf32>
    %c0_3 = arith.constant 0 : index
    %c0_4 = arith.constant 0 : index
    %c0_5 = arith.constant 0 : index
    %7 = vector.load %arg4[%c0_3, %c0_4, %c0_5] : memref<1x8x32xf32, #tpu.memory_space<vmem>>, vector<1x8x32xf32>
    %8 = vector.shape_cast %7 : vector<1x8x32xf32> to vector<8x32xf32>
    %c0_6 = arith.constant 0 : index
    %c0_7 = arith.constant 0 : index
    %c0_8 = arith.constant 0 : index
    %9 = vector.load %arg5[%c0_6, %c0_7, %c0_8] : memref<1x8x32xf32, #tpu.memory_space<vmem>>, vector<1x8x32xf32>
    %10 = vector.shape_cast %9 : vector<1x8x32xf32> to vector<8x32xf32>
    %c0_9 = arith.constant 0 : index
    %c0_10 = arith.constant 0 : index
    %11 = vector.load %arg7[%c0_9, %c0_10] : memref<8x4xf32, #tpu.memory_space<vmem>>, vector<8x4xf32>
    %c0_11 = arith.constant 0 : index
    %c0_12 = arith.constant 0 : index
    %12 = vector.load %arg8[%c0_11, %c0_12] : memref<8x4xf32, #tpu.memory_space<vmem>>, vector<8x4xf32>
    %c0_13 = arith.constant 0 : index
    %c0_14 = arith.constant 0 : index
    %13 = vector.load %arg9[%c0_13, %c0_14] : memref<8x32xf32, #tpu.memory_space<vmem>>, vector<8x32xf32>
    %14 = vector.extract_strided_slice %6 {offsets = [0, 0], sizes = [8, 8], strides = [1, 1]} : vector<8x32xf32> to vector<8x8xf32>
    %15 = vector.extract_strided_slice %8 {offsets = [0, 0], sizes = [8, 8], strides = [1, 1]} : vector<8x32xf32> to vector<8x8xf32>
    %16 = vector.extract_strided_slice %10 {offsets = [0, 0], sizes = [8, 8], strides = [1, 1]} : vector<8x32xf32> to vector<8x8xf32>
    %cst_15 = arith.constant dense<0.000000e+00> : vector<8x8xf32>
    %17 = tpu.matmul %14, %15, %cst_15 {dimension_numbers = #tpu.dot_dimension_numbers<[1], [1], [0], [0], [0, 0, 1, 0], [], []>} : vector<8x8xf32>, vector<8x8xf32>, vector<8x8xf32> -> vector<8x8xf32>
    %18 = vector.extract_strided_slice %11 {offsets = [0, 0], sizes = [8, 1], strides = [1, 1]} : vector<8x4xf32> to vector<8x1xf32>
    %cst_16 = arith.constant dense<0xFF800000> : vector<8xf32>
    %19 = vector.multi_reduction <maximumf>, %17, %cst_16 [1] : vector<8x8xf32> to vector<8xf32>
    %20 = vector.shape_cast %19 : vector<8xf32> to vector<8x1xf32>
    %21 = arith.maximumf %18, %20 : vector<8x1xf32>
    %22 = arith.subf %18, %21 : vector<8x1xf32>
    %23 = math.exp %22 : vector<8x1xf32>
    %24 = vector.broadcast %21 : vector<8x1xf32> to vector<8x8xf32>
    %25 = arith.subf %17, %24 : vector<8x8xf32>
    %26 = math.exp %25 : vector<8x8xf32>
    %27 = vector.extract_strided_slice %12 {offsets = [0, 0], sizes = [8, 1], strides = [1, 1]} : vector<8x4xf32> to vector<8x1xf32>
    %28 = arith.mulf %23, %27 : vector<8x1xf32>
    %cst_17 = arith.constant dense<0.000000e+00> : vector<8xf32>
    %29 = vector.multi_reduction <add>, %26, %cst_17 [1] : vector<8x8xf32> to vector<8xf32>
    %30 = vector.shape_cast %29 : vector<8xf32> to vector<8x1xf32>
    %31 = arith.addf %28, %30 : vector<8x1xf32>
    %cst_18 = arith.constant dense<0.000000e+00> : vector<8x8xf32>
    %32 = tpu.matmul %26, %16, %cst_18 {dimension_numbers = #tpu.dot_dimension_numbers<[1], [0], [0], [1], [0, 0, 1, 1], [], []>} : vector<8x8xf32>, vector<8x8xf32>, vector<8x8xf32> -> vector<8x8xf32>
    %33 = vector.extract_strided_slice %13 {offsets = [0, 0], sizes = [8, 8], strides = [1, 1]} : vector<8x32xf32> to vector<8x8xf32>
    %34 = vector.broadcast %23 : vector<8x1xf32> to vector<8x8xf32>
    %35 = arith.mulf %34, %33 : vector<8x8xf32>
    %36 = arith.addf %35, %32 : vector<8x8xf32>
    %37 = vector.extract_strided_slice %6 {offsets = [0, 8], sizes = [8, 8], strides = [1, 1]} : vector<8x32xf32> to vector<8x8xf32>
    %38 = vector.extract_strided_slice %8 {offsets = [0, 8], sizes = [8, 8], strides = [1, 1]} : vector<8x32xf32> to vector<8x8xf32>
    %39 = vector.extract_strided_slice %10 {offsets = [0, 8], sizes = [8, 8], strides = [1, 1]} : vector<8x32xf32> to vector<8x8xf32>
    %cst_19 = arith.constant dense<0.000000e+00> : vector<8x8xf32>
    %40 = tpu.matmul %37, %38, %cst_19 {dimension_numbers = #tpu.dot_dimension_numbers<[1], [1], [0], [0], [0, 0, 1, 0], [], []>} : vector<8x8xf32>, vector<8x8xf32>, vector<8x8xf32> -> vector<8x8xf32>
    %41 = vector.extract_strided_slice %11 {offsets = [0, 1], sizes = [8, 1], strides = [1, 1]} : vector<8x4xf32> to vector<8x1xf32>
    %cst_20 = arith.constant dense<0xFF800000> : vector<8xf32>
    %42 = vector.multi_reduction <maximumf>, %40, %cst_20 [1] : vector<8x8xf32> to vector<8xf32>
    %43 = vector.shape_cast %42 : vector<8xf32> to vector<8x1xf32>
    %44 = arith.maximumf %41, %43 : vector<8x1xf32>
    %45 = arith.subf %41, %44 : vector<8x1xf32>
    %46 = math.exp %45 : vector<8x1xf32>
    %47 = vector.broadcast %44 : vector<8x1xf32> to vector<8x8xf32>
    %48 = arith.subf %40, %47 : vector<8x8xf32>
    %49 = math.exp %48 : vector<8x8xf32>
    %50 = vector.extract_strided_slice %12 {offsets = [0, 1], sizes = [8, 1], strides = [1, 1]} : vector<8x4xf32> to vector<8x1xf32>
    %51 = arith.mulf %46, %50 : vector<8x1xf32>
    %cst_21 = arith.constant dense<0.000000e+00> : vector<8xf32>
    %52 = vector.multi_reduction <add>, %49, %cst_21 [1] : vector<8x8xf32> to vector<8xf32>
    %53 = vector.shape_cast %52 : vector<8xf32> to vector<8x1xf32>
    %54 = arith.addf %51, %53 : vector<8x1xf32>
    %cst_22 = arith.constant dense<0.000000e+00> : vector<8x8xf32>
    %55 = tpu.matmul %49, %39, %cst_22 {dimension_numbers = #tpu.dot_dimension_numbers<[1], [0], [0], [1], [0, 0, 1, 1], [], []>} : vector<8x8xf32>, vector<8x8xf32>, vector<8x8xf32> -> vector<8x8xf32>
    %56 = vector.extract_strided_slice %13 {offsets = [0, 8], sizes = [8, 8], strides = [1, 1]} : vector<8x32xf32> to vector<8x8xf32>
    %57 = vector.broadcast %46 : vector<8x1xf32> to vector<8x8xf32>
    %58 = arith.mulf %57, %56 : vector<8x8xf32>
    %59 = arith.addf %58, %55 : vector<8x8xf32>
    %60 = vector.extract_strided_slice %6 {offsets = [0, 16], sizes = [8, 8], strides = [1, 1]} : vector<8x32xf32> to vector<8x8xf32>
    %61 = vector.extract_strided_slice %8 {offsets = [0, 16], sizes = [8, 8], strides = [1, 1]} : vector<8x32xf32> to vector<8x8xf32>
    %62 = vector.extract_strided_slice %10 {offsets = [0, 16], sizes = [8, 8], strides = [1, 1]} : vector<8x32xf32> to vector<8x8xf32>
    %cst_23 = arith.constant dense<0.000000e+00> : vector<8x8xf32>
    %63 = tpu.matmul %60, %61, %cst_23 {dimension_numbers = #tpu.dot_dimension_numbers<[1], [1], [0], [0], [0, 0, 1, 0], [], []>} : vector<8x8xf32>, vector<8x8xf32>, vector<8x8xf32> -> vector<8x8xf32>
    %64 = vector.extract_strided_slice %11 {offsets = [0, 2], sizes = [8, 1], strides = [1, 1]} : vector<8x4xf32> to vector<8x1xf32>
    %cst_24 = arith.constant dense<0xFF800000> : vector<8xf32>
    %65 = vector.multi_reduction <maximumf>, %63, %cst_24 [1] : vector<8x8xf32> to vector<8xf32>
    %66 = vector.shape_cast %65 : vector<8xf32> to vector<8x1xf32>
    %67 = arith.maximumf %64, %66 : vector<8x1xf32>
    %68 = arith.subf %64, %67 : vector<8x1xf32>
    %69 = math.exp %68 : vector<8x1xf32>
    %70 = vector.broadcast %67 : vector<8x1xf32> to vector<8x8xf32>
    %71 = arith.subf %63, %70 : vector<8x8xf32>
    %72 = math.exp %71 : vector<8x8xf32>
    %73 = vector.extract_strided_slice %12 {offsets = [0, 2], sizes = [8, 1], strides = [1, 1]} : vector<8x4xf32> to vector<8x1xf32>
    %74 = arith.mulf %69, %73 : vector<8x1xf32>
    %cst_25 = arith.constant dense<0.000000e+00> : vector<8xf32>
    %75 = vector.multi_reduction <add>, %72, %cst_25 [1] : vector<8x8xf32> to vector<8xf32>
    %76 = vector.shape_cast %75 : vector<8xf32> to vector<8x1xf32>
    %77 = arith.addf %74, %76 : vector<8x1xf32>
    %cst_26 = arith.constant dense<0.000000e+00> : vector<8x8xf32>
    %78 = tpu.matmul %72, %62, %cst_26 {dimension_numbers = #tpu.dot_dimension_numbers<[1], [0], [0], [1], [0, 0, 1, 1], [], []>} : vector<8x8xf32>, vector<8x8xf32>, vector<8x8xf32> -> vector<8x8xf32>
    %79 = vector.extract_strided_slice %13 {offsets = [0, 16], sizes = [8, 8], strides = [1, 1]} : vector<8x32xf32> to vector<8x8xf32>
    %80 = vector.broadcast %69 : vector<8x1xf32> to vector<8x8xf32>
    %81 = arith.mulf %80, %79 : vector<8x8xf32>
    %82 = arith.addf %81, %78 : vector<8x8xf32>
    %83 = vector.extract_strided_slice %6 {offsets = [0, 24], sizes = [8, 8], strides = [1, 1]} : vector<8x32xf32> to vector<8x8xf32>
    %84 = vector.extract_strided_slice %8 {offsets = [0, 24], sizes = [8, 8], strides = [1, 1]} : vector<8x32xf32> to vector<8x8xf32>
    %85 = vector.extract_strided_slice %10 {offsets = [0, 24], sizes = [8, 8], strides = [1, 1]} : vector<8x32xf32> to vector<8x8xf32>
    %cst_27 = arith.constant dense<0.000000e+00> : vector<8x8xf32>
    %86 = tpu.matmul %83, %84, %cst_27 {dimension_numbers = #tpu.dot_dimension_numbers<[1], [1], [0], [0], [0, 0, 1, 0], [], []>} : vector<8x8xf32>, vector<8x8xf32>, vector<8x8xf32> -> vector<8x8xf32>
    %87 = vector.extract_strided_slice %11 {offsets = [0, 3], sizes = [8, 1], strides = [1, 1]} : vector<8x4xf32> to vector<8x1xf32>
    %cst_28 = arith.constant dense<0xFF800000> : vector<8xf32>
    %88 = vector.multi_reduction <maximumf>, %86, %cst_28 [1] : vector<8x8xf32> to vector<8xf32>
    %89 = vector.shape_cast %88 : vector<8xf32> to vector<8x1xf32>
    %90 = arith.maximumf %87, %89 : vector<8x1xf32>
    %91 = arith.subf %87, %90 : vector<8x1xf32>
    %92 = math.exp %91 : vector<8x1xf32>
    %93 = vector.broadcast %90 : vector<8x1xf32> to vector<8x8xf32>
    %94 = arith.subf %86, %93 : vector<8x8xf32>
    %95 = math.exp %94 : vector<8x8xf32>
    %96 = vector.extract_strided_slice %12 {offsets = [0, 3], sizes = [8, 1], strides = [1, 1]} : vector<8x4xf32> to vector<8x1xf32>
    %97 = arith.mulf %92, %96 : vector<8x1xf32>
    %cst_29 = arith.constant dense<0.000000e+00> : vector<8xf32>
    %98 = vector.multi_reduction <add>, %95, %cst_29 [1] : vector<8x8xf32> to vector<8xf32>
    %99 = vector.shape_cast %98 : vector<8xf32> to vector<8x1xf32>
    %100 = arith.addf %97, %99 : vector<8x1xf32>
    %cst_30 = arith.constant dense<0.000000e+00> : vector<8x8xf32>
    %101 = tpu.matmul %95, %85, %cst_30 {dimension_numbers = #tpu.dot_dimension_numbers<[1], [0], [0], [1], [0, 0, 1, 1], [], []>} : vector<8x8xf32>, vector<8x8xf32>, vector<8x8xf32> -> vector<8x8xf32>
    %102 = vector.extract_strided_slice %13 {offsets = [0, 24], sizes = [8, 8], strides = [1, 1]} : vector<8x32xf32> to vector<8x8xf32>
    %103 = vector.broadcast %92 : vector<8x1xf32> to vector<8x8xf32>
    %104 = arith.mulf %103, %102 : vector<8x8xf32>
    %105 = arith.addf %104, %101 : vector<8x8xf32>
    %106 = tpu.concatenate %21, %44, %67, %90 in 1 : vector<8x1xf32>, vector<8x1xf32>, vector<8x1xf32>, vector<8x1xf32> -> vector<8x4xf32>
    %c0_31 = arith.constant 0 : index
    %c0_32 = arith.constant 0 : index
    %107 = vector.load %arg7[%c0_31, %c0_32] : memref<8x4xf32, #tpu.memory_space<vmem>>, vector<8x4xf32>
    tpu.vector_store %arg7[%c0_31, %c0_32], %106 {strides = array<i32>} : memref<8x4xf32, #tpu.memory_space<vmem>>, vector<8x4xf32>,
    %108 = tpu.concatenate %31, %54, %77, %100 in 1 : vector<8x1xf32>, vector<8x1xf32>, vector<8x1xf32>, vector<8x1xf32> -> vector<8x4xf32>
    %c0_33 = arith.constant 0 : index
    %c0_34 = arith.constant 0 : index
    %109 = vector.load %arg8[%c0_33, %c0_34] : memref<8x4xf32, #tpu.memory_space<vmem>>, vector<8x4xf32>
    tpu.vector_store %arg8[%c0_33, %c0_34], %108 {strides = array<i32>} : memref<8x4xf32, #tpu.memory_space<vmem>>, vector<8x4xf32>,
    %110 = tpu.concatenate %36, %59, %82, %105 in 1 : vector<8x8xf32>, vector<8x8xf32>, vector<8x8xf32>, vector<8x8xf32> -> vector<8x32xf32>
    %c0_35 = arith.constant 0 : index
    %c0_36 = arith.constant 0 : index
    %111 = vector.load %arg9[%c0_35, %c0_36] : memref<8x32xf32, #tpu.memory_space<vmem>>, vector<8x32xf32>
    tpu.vector_store %arg9[%c0_35, %c0_36], %110 {strides = array<i32>} : memref<8x32xf32, #tpu.memory_space<vmem>>, vector<8x32xf32>,
    %c0_i32_37 = arith.constant 0 : i32
    %112 = arith.cmpi eq, %arg2, %c0_i32_37 : i32
    %113 = arith.extui %112 : i1 to i32
    %c0_i32_38 = arith.constant 0 : i32
    %114 = arith.cmpi ne, %113, %c0_i32_38 : i32
    scf.if %114 {
      %c0_39 = arith.constant 0 : index
      %c0_40 = arith.constant 0 : index
      %115 = vector.load %arg8[%c0_39, %c0_40] : memref<8x4xf32, #tpu.memory_space<vmem>>, vector<8x4xf32>
      %116 = tpu.reciprocal %115 {approx = true} : vector<8x4xf32> -> vector<8x4xf32>
      %117 = arith.mulf %115, %116 : vector<8x4xf32>
      %cst_41 = arith.constant 2.000000e+00 : f32
      %118 = vector.broadcast %cst_41 : f32 to vector<8x4xf32>
      %119 = arith.subf %118, %117 : vector<8x4xf32>
      %120 = arith.mulf %116, %119 : vector<8x4xf32>
      %c0_42 = arith.constant 0 : index
      %c0_43 = arith.constant 0 : index
      %121 = vector.load %arg9[%c0_42, %c0_43] : memref<8x32xf32, #tpu.memory_space<vmem>>, vector<8x32xf32>
      %122 = vector.extract_strided_slice %121 {offsets = [0, 0], sizes = [8, 8], strides = [1, 1]} : vector<8x32xf32> to vector<8x8xf32>
      %123 = vector.extract_strided_slice %120 {offsets = [0, 0], sizes = [8, 1], strides = [1, 1]} : vector<8x4xf32> to vector<8x1xf32>
      %124 = vector.broadcast %123 : vector<8x1xf32> to vector<8x8xf32>
      %125 = arith.mulf %122, %124 : vector<8x8xf32>
      %126 = vector.extract_strided_slice %121 {offsets = [0, 8], sizes = [8, 8], strides = [1, 1]} : vector<8x32xf32> to vector<8x8xf32>
      %127 = vector.extract_strided_slice %120 {offsets = [0, 1], sizes = [8, 1], strides = [1, 1]} : vector<8x4xf32> to vector<8x1xf32>
      %128 = vector.broadcast %127 : vector<8x1xf32> to vector<8x8xf32>
      %129 = arith.mulf %126, %128 : vector<8x8xf32>
      %130 = vector.extract_strided_slice %121 {offsets = [0, 16], sizes = [8, 8], strides = [1, 1]} : vector<8x32xf32> to vector<8x8xf32>
      %131 = vector.extract_strided_slice %120 {offsets = [0, 2], sizes = [8, 1], strides = [1, 1]} : vector<8x4xf32> to vector<8x1xf32>
      %132 = vector.broadcast %131 : vector<8x1xf32> to vector<8x8xf32>
      %133 = arith.mulf %130, %132 : vector<8x8xf32>
      %134 = vector.extract_strided_slice %121 {offsets = [0, 24], sizes = [8, 8], strides = [1, 1]} : vector<8x32xf32> to vector<8x8xf32>
      %135 = vector.extract_strided_slice %120 {offsets = [0, 3], sizes = [8, 1], strides = [1, 1]} : vector<8x4xf32> to vector<8x1xf32>
      %136 = vector.broadcast %135 : vector<8x1xf32> to vector<8x8xf32>
      %137 = arith.mulf %134, %136 : vector<8x8xf32>
      %138 = tpu.concatenate %125, %129, %133, %137 in 1 : vector<8x8xf32>, vector<8x8xf32>, vector<8x8xf32>, vector<8x8xf32> -> vector<8x32xf32>
      %c0_44 = arith.constant 0 : index
      %c0_45 = arith.constant 0 : index
      %c0_46 = arith.constant 0 : index
      %139 = vector.load %arg6[%c0_44, %c0_45, %c0_46] : memref<1x8x32xf32, #tpu.memory_space<vmem>>, vector<1x8x32xf32>
      %140 = vector.shape_cast %139 : vector<1x8x32xf32> to vector<8x32xf32>
      %141 = vector.shape_cast %138 : vector<8x32xf32> to vector<1x8x32xf32>
      tpu.vector_store %arg6[%c0_44, %c0_45, %c0_46], %141 {strides = array<i32>} : memref<1x8x32xf32, #tpu.memory_space<vmem>>, vector<1x8x32xf32>,
    } else {
    }
    return
  }
  func.func @transform_0(%arg0: i32, %arg1: i32, %arg2: i32) -> (i32, i32, i32) {
    %c0_i32 = arith.constant 0 : i32
    %c0_i32_0 = arith.constant 0 : i32
    return %arg0, %arg1, %c0_i32 : i32, i32, i32
  }
  func.func @transform_1(%arg0: i32, %arg1: i32, %arg2: i32) -> (i32, i32, i32) {
    %c0_i32 = arith.constant 0 : i32
    %c0_i32_0 = arith.constant 0 : i32
    return %arg0, %arg2, %c0_i32 : i32, i32, i32
  }
  func.func @transform_2(%arg0: i32, %arg1: i32, %arg2: i32) -> (i32, i32, i32) {
    %c0_i32 = arith.constant 0 : i32
    %c0_i32_0 = arith.constant 0 : i32
    return %arg0, %arg2, %c0_i32 : i32, i32, i32
  }
  func.func @transform_3(%arg0: i32, %arg1: i32, %arg2: i32) -> (i32, i32, i32) {
    %c0_i32 = arith.constant 0 : i32
    %c0_i32_0 = arith.constant 0 : i32
    return %arg0, %arg1, %c0_i32 : i32, i32, i32
  }
}

</mosaic_0001>

<bundles_post_ra>
// kernel: _mha_forward.5
= control target key start
LH: loop header
LB: loop body
LE: loop exit
PB: predicated region body
PF: predicated region fallthrough
CT: control target
= control target key end

     0   :  { %8 = vsyncpa [#allocation4], 0  ;;  %s1071_s0 = inlined_call_operand.hbm [shape: f32[16,32], index: 0, kind: input, shape index: {}]   ;;  %s1072_s1 = inlined_call_operand.hbm [shape: f32[32,32], index: 1, kind: input, shape index: {}]   ;;  %s1073_s2 = inlined_call_operand.hbm [shape: f32[1,32], index: 2, kind: input, shape index: {}]   ;;  %s1074_s3 = inlined_call_operand.hbm [shape: f32[16,32], index: 3, kind: output, shape index: {}]  }
   0x1   :  { %10 = vsyncpa [#allocation4 + $0x1], 0 }
   0x2   :  { %11 = vsyncpa [#allocation7], 0 }
   0x3   :  { %12 = vsyncpa [#allocation5], 0 }
   0x4   :  { %14 = vsyncpa [#allocation5 + $0x1], 0  ;;  %s812_s12 = smov 0   ;;  %s814_s13 = smov 0  }
   0x5   :  { %s816_s14 = smov 0   ;;  %s818_s15 = smov 0  }
   0x6   :  { %s820_s16 = smov 0   ;;  %s822_s17 = smov 0  }
   0x7 LB: > { %s480_s18 = sadd.s32 4294967295, %s781_s17   ;;  %s481_s19 = sadd.s32 4294967294, %s781_s17   ;;  %s781_s17 = sphi %s822_s17, %s20_s17   ;;  %s777_s16 = sphi %s820_s16, %s1096_s16   ;;  %s773_s15 = sphi %s818_s15, %s1095_s15   ;;  %s769_s14 = sphi %s816_s14, %s1094_s14   ;;  %s765_s13 = sphi %s814_s13, %s1093_s13   ;;  %s761_s12 = sphi %s812_s12, %s1092_s12  }
   0x8   : > { %p61_p0 = scmp.ne.s32.totalorder %s765_s13, %s761_s12  ;;  %p846_p1 = scmp.eq.s32.totalorder %s480_s18, 0 }
   0x9   : > { %p850_p2 = scmp.eq.s32.totalorder %s480_s18, 1  ;;  %p147_p3 = scmp.eq.s32.totalorder %s481_s19, 1 }
   0xa   : > { %s1079_s20 = scalar_select %p846_p1, 1, 0 }
   0xb   : > { %p856_p4 = por %p846_p1, %p61_p0  ;;  %p482_p5 = scmp.ge.s32.totalorder %s781_s17, 1 }
   0xc   : > { %p861_p6 = por %p147_p3, %p61_p0  ;;  %p154_p7 = scmp.lt.s32.totalorder %s781_s17, 3 }
   0xd   : > { %s1081_s22 = scalar_select %p856_p4, 1, 0 }
   0xe   : > { %s1082_s23 = scalar_select %p861_p6, 1, 0 }
   0xf   : > { %p866_p8 = pnand %p482_p5, %p154_p7  ;;  %s783_s25 = smov [#allocation6]  }
  0x10   : > { %s170_s26 = sshll.u32 %s783_s25, 4  ;;  %s784_s28 = smov [#allocation8]   ;;  %s870_s26 = int_to_ptr.vmem [resolvable:$true] %s170_s26 }
  0x11   : > { %p533_p9 = pneg %p866_p8  ;;  %s186_s29 = sshll.u32 %s784_s28, 4  ;;  %s881_s29 = int_to_ptr.vmem [resolvable:$true] %s186_s29 }
  0x12   : > { %s609_s5 = scalar_lea.hbm %s1072_s1, 512 }
  0x13   : > { %p877_p11 = pnand %p533_p9, %p846_p1  ;;  %p610_p12 = scmp.ne.s32.totalorder %s1072_s1, %s609_s5 }
  0x14   : > { %p616_p5 = scmp.lt.u32.totalorder %s609_s5, %s1072_s1 }
  0x15   : > { %p611_p13 = pneg %p877_p11 }
  0x17   : > { %p612_p0 = pnand %p611_p13, %p610_p12 }
  0x19   : > { %p613_p3 = pneg %p612_p0 }
  0x1b   : > { %p618_p7 = pnand %p616_p5, %p613_p3 }
  0x1d   : > { %621 = shalt.err (!%p618_p7)
}
  0x1e   : > { %s622_s10 = scalar_lea.vmem %s870_s26, 512  ;;  %p630_p1 = scmp.lt.s32.totalorder %s870_s26, %s870_s26 }
  0x1f   : > { %p623_p9 = scmp.ne.s32.totalorder %s870_s26, %s622_s10  ;;  %p631_p12 = scmp.lt.s32.totalorder %s622_s10, %s622_s10 }
  0x21   : > { %p625_p10 = pnand %p623_p9, %p611_p13  ;;  %p632_p0 = por %p631_p12, %p630_p1 }
  0x23   : > { %p626_p6 = pneg %p625_p10 }
  0x25   : > { %p633_p4 = pnand %p632_p0, %p626_p6 }
  0x27   : > { %636 = shalt.err (!%p633_p4)
}
  0x28   : > { %s785_s11 = smov 128   ;;  %s786_s18 = smov 8  }
  0x29   : > { %536 = dma.hbm_to_vmem [thread:$0]  (!%p877_p11), %s1072_s1, 512, %s870_s26, [#allocation7], %s785_s11, %s785_s11, %s786_s18  }
  0x2a   : > { %s637_s4 = scalar_lea.hbm %s1073_s2, 16 }
  0x2b   : > { %p638_p1 = scmp.ne.s32.totalorder %s1073_s2, %s637_s4  ;;  %p644_p10 = scmp.lt.u32.totalorder %s637_s4, %s1073_s2 }
  0x2d   : > { %p640_p4 = pnand %p638_p1, %p611_p13 }
  0x2f   : > { %p641_p6 = pneg %p640_p4 }
  0x31   : > { %p646_p3 = pnand %p644_p10, %p641_p6 }
  0x33   : > { %649 = shalt.err (!%p646_p3)
}
  0x34   : > { %s650_s26 = scalar_lea.vmem %s881_s29, 16  ;;  %s657_s9 = scalar_lea.vmem %s881_s29, 32 }
  0x35   : > { %p651_p5 = scmp.ne.s32.totalorder %s881_s29, %s650_s26  ;;  %p658_p12 = scmp.lt.s32.totalorder %s881_s29, %s881_s29 }
  0x36   : > { %p659_p0 = scmp.lt.s32.totalorder %s657_s9, %s650_s26 }
  0x37   : > { %p653_p7 = pnand %p651_p5, %p611_p13 }
  0x38   : > { %p660_p1 = por %p659_p0, %p658_p12 }
  0x39   : > { %p654_p9 = pneg %p653_p7 }
  0x3b   : > { %p661_p4 = pnand %p660_p1, %p654_p9 }
  0x3d   : > { %664 = shalt.err (!%p661_p4)
}
  0x3e   : > { %539 = dma.hbm_to_vmem [thread:$0]  (!%p877_p11), %s1073_s2, 16, %s881_s29, [#allocation7]  }
  0x3f   : > { %s39_s18 = sadd.s32 1, %s777_s16  ;;  %s48_s19 = sadd.s32 1, %s769_s14 }
  0x40   : > { %p41_p13 = scmp.ge.s32.totalorder %s39_s18, 2  ;;  %p55_p6 = scmp.ne.s32.totalorder %s769_s14, %s765_s13 }
  0x41   : > { %p56_p10 = scmp.eq.s32.totalorder %s781_s17, 0  ;;  %p550_p3 = scmp.lt.s32.totalorder %s781_s17, 2 }
  0x42   : > { %s1098_s18 = smov (%p41_p13, %s39_s18), 0  ;;  %p946_p7 = por %p850_p2, %p55_p6 }
  0x43   : > { %p57_p5 = por %p56_p10, %p55_p6  ;;  %s43_s25 = ssub.s32 %s777_s16, %s1098_s18 }
  0x44   : > { %s1085_s27 = scalar_select %p946_p7, 1, 0 }
  0x45   : > { %s197_s28 = sand.u32 1, %s769_s14   ;;  %p46_p9 = scmp.eq.s32.totalorder %s43_s25, 0 }
  0x46   : > { %s486_s29 = sshll.u32 %s197_s28, 3  ;;  %s487_s30 = sshll.u32 %s777_s16, 7 }
  0x47   : > { %s955_s4 = scalar_select %p46_p9, %s769_s14, %s48_s19  }
  0x48   : > { %s960_s7 = scalar_lea.hbm %s1071_s0, %s487_s30  ;;  %s201_s21 = scalar_lea.vmem [#allocation3], %s486_s29 }
  0x49   : > { %s209_s8 = sshll.u32 %s201_s21, 4  ;;  %p964_p2 = pnand %p550_p3, %p57_p5  ;;  %s968_s8 = int_to_ptr.vmem [resolvable:$true] %s209_s8 }
  0x4a   : > { %s198_s9 = scalar_lea.sflag [#allocation4], %s197_s28  ;;  %s665_s10 = scalar_lea.hbm %s960_s7, 128 }
  0x4b   : > { %p666_p11 = scmp.ne.s32.totalorder %s960_s7, %s665_s10  ;;  %p667_p12 = pneg %p964_p2 }
  0x4c   : > { %s670_s25 = scalar_lea.hbm %s1071_s0, 256  ;;  %p671_p4 = scmp.lt.u32.totalorder %s960_s7, %s1071_s0 }
  0x4d   : > { %p668_p0 = pnand %p667_p12, %p666_p11  ;;  %p672_p13 = scmp.lt.u32.totalorder %s670_s25, %s665_s10 }
  0x4e   : > { %p674_p10 = scmp.lt.u32.totalorder %s665_s10, %s960_s7 }
  0x4f   : > { %p669_p1 = pneg %p668_p0  ;;  %p673_p6 = por %p672_p13, %p671_p4 }
  0x51   : > { %p675_p3 = por %p674_p10, %p673_p6 }
  0x53   : > { %p676_p5 = pnand %p675_p3, %p669_p1 }
  0x55   : > { %679 = shalt.err (!%p676_p5)
}
  0x56   : > { %s680_s28 = scalar_lea.vmem %s968_s8, 128  ;;  %s787_s5 = smov [#allocation3]  }
  0x57   : > { %p681_p9 = scmp.ne.s32.totalorder %s968_s8, %s680_s28  ;;  %s685_s6 = sshll.u32 %s787_s5, 4  ;;  %s686_s6 = int_to_ptr.vmem [resolvable:$false] %s685_s6 }
  0x58   : > { %s687_s21 = scalar_lea.vmem %s686_s6, 256  ;;  %p688_p7 = scmp.lt.s32.totalorder %s968_s8, %s686_s6 }
  0x59   : > { %p683_p11 = pnand %p681_p9, %p667_p12  ;;  %p689_p4 = scmp.lt.s32.totalorder %s687_s21, %s680_s28 }
  0x5b   : > { %p684_p0 = pneg %p683_p11  ;;  %p690_p13 = por %p689_p4, %p688_p7 }
  0x5d   : > { %p691_p6 = pnand %p690_p13, %p684_p0 }
  0x5f   : > { %694 = shalt.err (!%p691_p6)
}
  0x60   : > { %543 = dma.hbm_to_vmem [thread:$0]  (!%p964_p2), %s960_s7, 128, %s968_s8, %s198_s9  }
  0x61   : > { %218 = sbr.rel (%p866_p8) target bundleno = 357 (0x165), region = 32  ;;  %s998_s10 = sand.u32 (!%p866_p8), 1, %s765_s13  }
  0x62   : > { %s489_s11 = sshll.u32 (!%p866_p8), %s998_s10, 3  ;;  %s221_s19 = scalar_lea.sflag (!%p866_p8), [#allocation4], %s998_s10 }
  0x63   : > { %s224_s25 = scalar_lea.vmem (!%p866_p8), [#allocation3], %s489_s11  ;;  %p1087_p7 = scmp.ne.s32.totalorder (!%p866_p8), %s1081_s22, 0 }
  0x68   : > { %748 = dma.done.wait (%p1087_p7), %s221_s19, 128  }
  0x69   : > { %750 = vsyncadd (%p1087_p7), %s221_s19, 4294967168  ;;  %p1088_p2 = scmp.ne.s32.totalorder %s1079_s20, 0 }
  0x6b   : > { %752 = dma.done.wait (%p1088_p2), [#allocation7], 528  }
  0x6c   : > { %754 = vsyncadd (%p1088_p2), [#allocation7], 4294966768  ;;  %vm260_vm0 = vcmask 261120   ;;  %v788_v0 = vmov 0.0|0.0   ;;  %v789_v1 = vmov 0.0   ;;  %vm790_vm1 = vmmov 0  }
  0x6d   : > { %515 = vmatprep.subr.bf16.mxu0 %v788_v0  ;;  %261 = vst.msk [vmem:[#allocation2] sm:$0xff] %vm260_vm0, %v789_v1  ;;  %512 = vmatprep.mubr.msk.f32.mxu0 %vm790_vm1, %v789_v1  ;;  %v264_v2 = vld [vmem:[#allocation6] sm:$0xff]  ;;  %v265_v3 = vld [vmem:[#allocation6 + $0x8] sm:$0xff]  ;;  %v266_v4 = vld [vmem:[#allocation6 + $0x10] sm:$0xff]  ;;  %s496_s20 = sshll.u32 %s773_s15, 7  ;;  %s254_s22 = scalar_lea.vmem [#allocation9], %s489_s11 }
  0x6e   : > { %v516_v5 = vpack.c.bf16 %v265_v3, %v264_v2  ;;  %v267_v6 = vld [vmem:[#allocation6 + $0x18] sm:$0xff]  ;;  %v494_v13 = vld [vmem:[#allocation8] ss:$0 sm:$0xff]  ;;  %s372_s24 = sshll.u32 %s254_s22, 4  ;;  %s1021_s26 = scalar_lea.hbm %s1074_s3, %s496_s20  ;;  %s1023_s24 = int_to_ptr.vmem [resolvable:$true] %s372_s24 }
  0x6f   : > { %v519_v7 = vpack.c.bf16 %v267_v6, %v266_v4  ;;  %v263_v8 = vld [vmem:[%s224_s25] sm:$0xff]  ;;  %s358_s9 = scalar_lea.sflag [#allocation5], %s998_s10  ;;  %s695_s29 = scalar_lea.vmem %s1023_s24, 128 }
  0x70   : > { %517 = vmatpush3.bf16.msra.mxu0 %v516_v5  ;;  %p696_p8 = scmp.ne.s32.totalorder %s1023_s24, %s695_s29  ;;  %p1089_p12 = scmp.ne.s32.totalorder %s1085_s27, 0 }
  0x71   : > { %518 = vmatprep.subr.bf16.mxu0 %v788_v0  ;;  %s791_s15 = smov [#allocation9]  }
  0x72   : > { %p697_p1 = pnand %p696_p8, %p1089_p12  ;;  %s699_s30 = sshll.u32 %s791_s15, 4  ;;  %s700_s30 = int_to_ptr.vmem [resolvable:$false] %s699_s30 }
  0x73   : > { %s701_s28 = scalar_lea.vmem %s700_s30, 256  ;;  %p702_p3 = scmp.lt.s32.totalorder %s1023_s24, %s700_s30 }
  0x74   : > { %520 = vmatpush3.bf16.msra.mxu0 %v519_v7  ;;  %v262_v9 = vld [vmem:[#allocation2] sm:$0xff]  ;;  %p698_p10 = pneg %p697_p1  ;;  %p703_p5 = scmp.lt.s32.totalorder %s701_s28, %s695_s29 }
  0x76   : > { %p704_p9 = por %p703_p5, %p702_p3 }
  0x77   : > { %513 = vmatmul.mubr.msk.f32.vlgmr.msra.gmra.mrb[0].mxu0 %vm260_vm0, %v263_v8 }
  0x78   : > { %p705_p11 = pnand %p704_p9, %p698_p10 }
 0x14a   : > { %v338_v10 = vpop.f32.mrb[0].mxu0 }
 0x14b   : > { %v342_v11 = vadd.f32 %v338_v10, %v262_v9  ;;  %v514_v12 = vpop.f32.mrb[1].mxu0 }
 0x14d   : > { %343 = vst.msk [vmem:[#allocation2] sm:$0xff] %vm260_vm0, %v342_v11 }
 0x154   : > { %v347_v14 = vld [vmem:[#allocation2] sm:$0xff] }
 0x155   : > { %v355_v15 = vadd.f32 %v494_v13, %v347_v14 }
 0x157   : > { %356 = vst.msk [vmem:[%s254_s22] sm:$0xff] %vm260_vm0, %v355_v15 }
 0x158   : > { %708 = shalt.err (!%p705_p11)
}
 0x159   : > { %s709_s5 = scalar_lea.hbm %s1021_s26, 128  ;;  %s713_s10 = scalar_lea.hbm %s1074_s3, 256 }
 0x15a   : > { %p710_p0 = scmp.ne.s32.totalorder %s1021_s26, %s709_s5  ;;  %p714_p6 = scmp.lt.u32.totalorder %s1021_s26, %s1074_s3 }
 0x15b   : > { %p715_p7 = scmp.lt.u32.totalorder %s713_s10, %s709_s5  ;;  %p717_p8 = scmp.lt.u32.totalorder %s709_s5, %s1021_s26 }
 0x15c   : > { %p711_p4 = pnand %p710_p0, %p1089_p12 }
 0x15d   : > { %p716_p2 = por %p715_p7, %p714_p6 }
 0x15e   : > { %p712_p13 = pneg %p711_p4 }
 0x15f   : > { %p718_p1 = por %p717_p8, %p716_p2 }
 0x161   : > { %p719_p10 = pnand %p718_p1, %p712_p13 }
 0x163   : > { %722 = shalt.err (!%p719_p10)
}
 0x164   : > { %531 = dma.vmem_to_hbm [thread:$0]  (%p1089_p12), %s1023_s24, 128, %s1021_s26, %s358_s9  }
 0x165 PF: > { %s384_s25 = sand.u32 1, %s761_s12   ;;  %p1090_p3 = scmp.ne.s32.totalorder %s1082_s23, 0 }
 0x166   : > { %p1091_p5 = scmp.ge.s32.totalorder %s781_s17, 2  ;;  %s385_s20 = scalar_lea.sflag [#allocation5], %s384_s25 }
 0x168   : > { %p545_p9 = pnand %p1091_p5, %p1090_p3 }
 0x16a   : > { %756 = dma.done.wait (!%p545_p9), %s385_s20, 128  }
 0x16b   : > { %758 = vsyncadd (!%p545_p9), %s385_s20, 4294967168  ;;  %s20_s17 = sadd.s32 1, %s781_s17   ;;  %s1092_s12 = smov %s765_s13 }
 0x16c   : > { %p17_p11 = scmp.ge.s32.totalorder %s20_s17, 4   ;;  %s1093_s13 = smov %s769_s14 }
 0x16d   : > { %s1094_s14 = smov %s955_s4  ;;  %s1095_s15 = smov %s777_s16 }
 0x16e   : > { %s1096_s16 = smov %s1098_s18  ;;  %19 = sbr.rel (!%p17_p11) target bundleno = 7 (0x7), region = 95 }
 0x175   :  { %390 = vsyncpa [#allocation4], 1 }
 0x176   :  { %392 = vsyncpa [#allocation4 + $0x1], 1 }
 0x177   :  { %393 = vsyncpa [#allocation7], 1 }
 0x178   :  { %394 = vsyncpa [#allocation5], 1 }
 0x179   :  { %396 = vsyncpa [#allocation5 + $0x1], 1 }

// kernel: _mha_forward.8
= control target key start
LH: loop header
LB: loop body
LE: loop exit
PB: predicated region body
PF: predicated region fallthrough
CT: control target
= control target key end

     0   :  { %s2038_s0 = inlined_call_operand.hbm [shape: f32[2,8,32], index: 0, kind: input, shape index: {}]   ;;  %s2039_s1 = inlined_call_operand.hbm [shape: f32[2,8,32], index: 1, kind: input, shape index: {}]   ;;  %s2040_s2 = inlined_call_operand.hbm [shape: f32[2,8,32], index: 2, kind: input, shape index: {}]   ;;  %s2041_s3 = inlined_call_operand.hbm [shape: f32[2,8,32], index: 3, kind: output, shape index: {}]  }
   0x1   :  { %2047 = sst [smem:[#allocation18_spill]] %s2039_s1 }
   0x2   :  { %8 = vsyncpa [#allocation6], 0 }
   0x3   :  { %10 = vsyncpa [#allocation6 + $0x1], 0 }
   0x4   :  { %11 = vsyncpa [#allocation9], 0 }
   0x5   :  { %13 = vsyncpa [#allocation9 + $0x1], 0 }
   0x6   :  { %14 = vsyncpa [#allocation7], 0 }
   0x7   :  { %16 = vsyncpa [#allocation7 + $0x1], 0  ;;  %s1650_s12 = smov 0   ;;  %s1652_s13 = smov 0  }
   0x8   :  { %s1654_s14 = smov 0   ;;  %s1656_s15 = smov 0  }
   0x9   :  { %s1658_s16 = smov 0   ;;  %s1660_s17 = smov 0  }
   0xa LB: > { %2048 = sst [smem:[#allocation15_spill]] %s1607_s16  ;;  %s1681_s18 = sadd.s32 4294967295, %s1611_s17   ;;  %s1611_s17 = sphi %s1660_s17, %s22_s17   ;;  %s1607_s16 = sphi %s1658_s16, %s2069_s16   ;;  %s1603_s15 = sphi %s1656_s15, %s2068_s15   ;;  %s1599_s14 = sphi %s1654_s14, %s2072_s14   ;;  %s1595_s13 = sphi %s1652_s13, %s2071_s13   ;;  %s1591_s12 = sphi %s1650_s12, %s2070_s12  }
   0xb   : > { %s1233_s19 = sadd.s32 4294967294, %s1611_s17   ;;  %s41_s20 = sadd.s32 1, %s1607_s16 }
   0xc   : > { %s50_s21 = sadd.s32 1, %s1599_s14  ;;  %p43_p0 = scmp.ge.s32.totalorder %s41_s20, 2 }
   0xd   : > { %p57_p1 = scmp.ne.s32.totalorder %s1599_s14, %s1595_s13  ;;  %p58_p2 = scmp.eq.s32.totalorder %s1611_s17, 0 }
   0xe   : > { %p63_p3 = scmp.ne.s32.totalorder %s1595_s13, %s1591_s12  ;;  %s2074_s20 = smov (%p43_p0, %s41_s20), 0 }
   0xf   : > { %2049 = sst [smem:[#allocation16_spill]] %s2074_s20  ;;  %p1693_p4 = por %p58_p2, %p57_p1 }
  0x10   : > { %p64_p5 = scmp.eq.s32.totalorder %s1681_s18, 0  ;;  %s45_s23 = ssub.s32 %s1607_s16, %s2074_s20 }
  0x11   : > { %p145_p6 = scmp.eq.s32.totalorder %s1681_s18, 1  ;;  %p48_p7 = scmp.eq.s32.totalorder %s45_s23, 0 }
  0x12   : > { %p1701_p8 = por %p64_p5, %p63_p3  ;;  %p151_p10 = scmp.eq.s32.totalorder %s1233_s19, 1 }
  0x13   : > { %p1705_p9 = por %p145_p6, %p57_p1  ;;  %p1341_p13 = scmp.lt.s32.totalorder %s1611_s17, 2 }
  0x14   : > { %s2051_s24 = scalar_select %p1701_p8, 1, 0 }
  0x15   : > { %s2052_s25 = scalar_select %p1705_p9, 1, 0 }
  0x16   : > { %s1710_s26 = scalar_select %p48_p7, %s1599_s14, %s50_s21  }
  0x17   : > { %p1712_p11 = por %p151_p10, %p63_p3  ;;  %s171_s28 = sand.u32 1, %s1599_s14  }
  0x18   : > { %2053 = sst [smem:[#allocation17_spill]] %s1710_s26  ;;  %s1721_s29 = sshll.u32 %s171_s28, 3 }
  0x19   : > { %s2054_s27 = scalar_select %p1712_p11, 1, 0 }
  0x1a   : > { %s1724_s30 = sshll.u32 %s1607_s16, 7  ;;  %p1728_p0 = pnand %p1341_p13, %p1693_p4 }
  0x1b   : > { %s190_s5 = sand.u32 1, %s1611_s17   ;;  %s2056_s1 = sld [smem:[#allocation18_spill]] }
  0x1c   : > { %s2055_s4 = scalar_select %p1728_p0, 1, 0 }
  0x1d   : > { %s194_s9 = scalar_lea.vmem [#allocation8], %s1721_s29  ;;  %s1744_s11 = scalar_lea.sflag [#allocation9], %s190_s5 }
  0x1e   : > { %s202_s10 = sshll.u32 %s194_s9, 4  ;;  %p1750_p4 = pneg %p1728_p0  ;;  %s1741_s10 = int_to_ptr.vmem [resolvable:$true] %s202_s10 }
  0x21   : > { %s1737_s8 = scalar_lea.hbm %s2056_s1, %s1724_s30  ;;  %s1440_s6 = scalar_lea.hbm %s2056_s1, 256 }
  0x22   : > { %s1435_s19 = scalar_lea.hbm %s1737_s8, 128  ;;  %p1441_p7 = scmp.lt.u32.totalorder %s1737_s8, %s2056_s1 }
  0x23   : > { %p1436_p3 = scmp.ne.s32.totalorder %s1737_s8, %s1435_s19  ;;  %p1442_p10 = scmp.lt.u32.totalorder %s1440_s6, %s1435_s19 }
  0x24   : > { %p1444_p12 = scmp.lt.u32.totalorder %s1435_s19, %s1737_s8 }
  0x25   : > { %p1438_p5 = pnand %p1750_p4, %p1436_p3  ;;  %p1443_p13 = por %p1442_p10, %p1441_p7 }
  0x27   : > { %p1439_p6 = pneg %p1438_p5  ;;  %p1445_p1 = por %p1444_p12, %p1443_p13 }
  0x29   : > { %p1446_p2 = pnand %p1445_p1, %p1439_p6 }
  0x2b   : > { %1449 = shalt.err (!%p1446_p2)
}
  0x2c   : > { %s1450_s5 = scalar_lea.vmem %s1741_s10, 128  ;;  %s1613_s22 = smov [#allocation8]  }
  0x2d   : > { %p1451_p3 = scmp.ne.s32.totalorder %s1741_s10, %s1450_s5  ;;  %s1455_s23 = sshll.u32 %s1613_s22, 4  ;;  %s1456_s23 = int_to_ptr.vmem [resolvable:$false] %s1455_s23 }
  0x2e   : > { %s1457_s7 = scalar_lea.vmem %s1456_s23, 256  ;;  %p1458_p9 = scmp.lt.s32.totalorder %s1741_s10, %s1456_s23 }
  0x2f   : > { %p1453_p5 = pnand %p1451_p3, %p1750_p4  ;;  %p1459_p8 = scmp.lt.s32.totalorder %s1457_s7, %s1450_s5 }
  0x31   : > { %p1454_p11 = pneg %p1453_p5  ;;  %p1460_p7 = por %p1459_p8, %p1458_p9 }
  0x33   : > { %p1461_p10 = pnand %p1460_p7, %p1454_p11 }
  0x35   : > { %1464 = shalt.err (!%p1461_p10)
}
  0x36   : > { %1333 = dma.hbm_to_vmem [thread:$0]  (!%p1728_p0), %s1737_s8, 128, %s1741_s10, %s1744_s11  }
  0x37   : > { %p2058_p12 = scmp.lt.s32.totalorder %s1611_s17, 3  ;;  %p2059_p1 = scmp.ge.s32.totalorder %s1611_s17, 1 }
  0x38   : > { %s1786_s5 = scalar_lea.hbm %s2038_s0, %s1724_s30  ;;  %s175_s22 = scalar_lea.vmem [#allocation5], %s1721_s29 }
  0x39   : > { %p1778_p2 = pnand %p2059_p1, %p2058_p12  ;;  %s183_s23 = sshll.u32 %s175_s22, 4  ;;  %s1789_s23 = int_to_ptr.vmem [resolvable:$true] %s183_s23 }
  0x3a   : > { %s1795_s7 = scalar_lea.hbm %s2040_s2, %s1724_s30  ;;  %s172_s1 = scalar_lea.sflag [#allocation6], %s171_s28 }
  0x3b   : > { %s2060_s19 = scalar_select %p1778_p2, 1, 0 }
  0x3c   : > { %s1465_s20 = scalar_lea.hbm %s1786_s5, 128  ;;  %s1470_s16 = scalar_lea.hbm %s2038_s0, 256 }
  0x3d   : > { %p1466_p8 = scmp.ne.s32.totalorder %s1786_s5, %s1465_s20  ;;  %p1471_p6 = scmp.lt.u32.totalorder %s1786_s5, %s2038_s0 }
  0x3e   : > { %p1472_p13 = scmp.lt.u32.totalorder %s1470_s16, %s1465_s20  ;;  %p1474_p5 = scmp.lt.u32.totalorder %s1465_s20, %s1786_s5 }
  0x3f   : > { %p1468_p9 = pnand %p1466_p8, %p1750_p4 }
  0x40   : > { %p1473_p3 = por %p1472_p13, %p1471_p6 }
  0x41   : > { %p1469_p11 = pneg %p1468_p9 }
  0x42   : > { %p1475_p7 = por %p1474_p5, %p1473_p3 }
  0x44   : > { %p1476_p10 = pnand %p1475_p7, %p1469_p11 }
  0x46   : > { %1479 = shalt.err (!%p1476_p10)
}
  0x47   : > { %s1480_s28 = scalar_lea.vmem %s1789_s23, 128  ;;  %s1614_s30 = smov [#allocation5]  }
  0x48   : > { %p1481_p12 = scmp.ne.s32.totalorder %s1789_s23, %s1480_s28  ;;  %s1485_s8 = sshll.u32 %s1614_s30, 4  ;;  %s1486_s8 = int_to_ptr.vmem [resolvable:$false] %s1485_s8 }
  0x49   : > { %s1487_s26 = scalar_lea.vmem %s1486_s8, 256  ;;  %p1488_p9 = scmp.lt.s32.totalorder %s1789_s23, %s1486_s8 }
  0x4a   : > { %p1483_p1 = pnand %p1481_p12, %p1750_p4  ;;  %p1489_p2 = scmp.lt.s32.totalorder %s1487_s26, %s1480_s28 }
  0x4c   : > { %p1484_p8 = pneg %p1483_p1  ;;  %p1490_p6 = por %p1489_p2, %p1488_p9 }
  0x4e   : > { %p1491_p13 = pnand %p1490_p6, %p1484_p8 }
  0x50   : > { %1494 = shalt.err (!%p1491_p13)
}
  0x51   : > { %1330 = dma.hbm_to_vmem [thread:$0]  (!%p1728_p0), %s1786_s5, 128, %s1789_s23, %s172_s1  }
  0x52   : > { %s213_s16 = scalar_lea.vmem [#allocation10], %s1721_s29  ;;  %s1495_s10 = scalar_lea.hbm %s1795_s7, 128 }
  0x53   : > { %s221_s20 = sshll.u32 %s213_s16, 4  ;;  %p1496_p11 = scmp.ne.s32.totalorder %s1795_s7, %s1495_s10  ;;  %s222_s20 = int_to_ptr.vmem [resolvable:$true] %s221_s20 }
  0x54   : > { %s1500_s22 = scalar_lea.hbm %s2040_s2, 256  ;;  %p1501_p5 = scmp.lt.u32.totalorder %s1795_s7, %s2040_s2 }
  0x55   : > { %p1498_p2 = pnand %p1496_p11, %p1750_p4  ;;  %p1502_p7 = scmp.lt.u32.totalorder %s1500_s22, %s1495_s10 }
  0x56   : > { %p1504_p12 = scmp.lt.u32.totalorder %s1495_s10, %s1795_s7 }
  0x57   : > { %p1499_p3 = pneg %p1498_p2  ;;  %p1503_p10 = por %p1502_p7, %p1501_p5 }
  0x59   : > { %p1505_p1 = por %p1504_p12, %p1503_p10 }
  0x5b   : > { %p1506_p8 = pnand %p1505_p1, %p1499_p3 }
  0x5d   : > { %1509 = shalt.err (!%p1506_p8)
}
  0x5e   : > { %s1510_s1 = scalar_lea.vmem %s222_s20, 128  ;;  %s1615_s29 = smov [#allocation10]  }
  0x5f   : > { %p1511_p9 = scmp.ne.s32.totalorder %s222_s20, %s1510_s1  ;;  %s1515_s5 = sshll.u32 %s1615_s29, 4  ;;  %s1516_s5 = int_to_ptr.vmem [resolvable:$false] %s1515_s5 }
  0x60   : > { %s1517_s23 = scalar_lea.vmem %s1516_s5, 256  ;;  %p1518_p11 = scmp.lt.s32.totalorder %s222_s20, %s1516_s5 }
  0x61   : > { %p1513_p6 = pnand %p1511_p9, %p1750_p4  ;;  %p1519_p2 = scmp.lt.s32.totalorder %s1517_s23, %s1510_s1 }
  0x63   : > { %p1514_p13 = pneg %p1513_p6  ;;  %p1520_p0 = por %p1519_p2, %p1518_p11 }
  0x65   : > { %p1521_p5 = pnand %p1520_p0, %p1514_p13 }
  0x67   : > { %1524 = shalt.err (!%p1521_p5)
}
  0x68   : > { %p2061_p7 = scmp.ne.s32.totalorder %s2055_s4, 0  ;;  %p2062_p3 = scmp.ne.s32.totalorder %s2060_s19, 0 }
  0x69   : > { %s1842_s21 = sand.u32 (!%p2062_p3), 1, %s1595_s13   ;;  %p2063_p0 = scmp.ne.s32.totalorder (!%p2062_p3), %s2051_s24, 0 }
  0x6a   : > { %1336 = dma.hbm_to_vmem [thread:$0]  (!%p2061_p7), %s1795_s7, 128, %s222_s20, %s1744_s11  }
  0x6b   : > { %230 = sbr.rel (%p2062_p3) target bundleno = 1502 (0x5de), region = 32  ;;  %s1845_s8 = sshll.u32 (!%p2062_p3), %s1842_s21, 3 }
  0x6c   : > { %s233_s26 = scalar_lea.sflag (!%p2062_p3), [#allocation6], %s1842_s21  ;;  %s236_s16 = scalar_lea.vmem (!%p2062_p3), [#allocation5], %s1845_s8 }
  0x72   : > { %1578 = dma.done.wait (%p2063_p0), %s233_s26, 128  }
  0x73   : > { %1580 = vsyncadd (%p2063_p0), %s233_s26, 4294967168  ;;  %s241_s4 = sand.u32 1, %s1681_s18   ;;  %s245_s19 = scalar_lea.vmem [#allocation8], %s1845_s8 }
  0x74   : > { %s242_s11 = scalar_lea.sflag [#allocation9], %s241_s4 }
  0x75   : > { %1582 = dma.done.wait (%p2063_p0), %s242_s11, 256  }
  0x76   : > { %1584 = vsyncadd (%p2063_p0), %s242_s11, 4294967040  ;;  %v1616_v0 = vmov 0.0   ;;  %vm1617_vm0 = vmmov 0   ;;  %vm303_vm1 = vcmask 64512   ;;  %v298_v1 = vld [vmem:[%s245_s19] sm:$0xff]  ;;  %v296_v2 = vld [vmem:[%s236_s16] sm:$0xff] }
  0x77   : > { %1279 = vmatprep.subr.mxu0 %v1616_v0  ;;  %1281 = vmatprep.mubr.msk.f32.mxu0 %vm1617_vm0, %v1616_v0  ;;  %v297_v3 = vmul.f32 0.35355338, %v296_v2  ;;  %vm291_vm2 = vcmask 31744   ;;  %v1618_v4 = vmov -inf   ;;  %v1619_v8 = vmov 0   ;;  %s1620_s18 = smov 120  }
  0x78   : > { %1284 = vmatprep.subr.mxu1 %v1616_v0  ;;  %1286 = vmatprep.mubr.msk.f32.mxu1 %vm1617_vm0, %v1616_v0  ;;  %292 = vst.msk [vmem:[#allocation2] sm:$0xff] %vm291_vm2, %v1618_v4  ;;  %293 = vst.msk [vmem:[#allocation3] sm:$0xff] %vm291_vm2, %v1616_v0  ;;  %s1621_s24 = smov 112   ;;  %s1622_s7 = smov 104   ;;  %v1623_v34 = vmov 1   ;;  %v1624_v35 = vmov 2  }
  0x79   : > { %1280 = vmatpush3.xpose.msk.msra.mxu0 %vm303_vm1, %v298_v1  ;;  %1404 = vset.pattern.permute.xlu0 %v1619_v8  ;;  %s254_s20 = scalar_lea.vmem [#allocation10], %s1845_s8  ;;  %vm294_vm3 = vcmask 261120   ;;  %vm1036_vm4 = vcmask 7168   ;;  %vm1038_vm5 = vcmask 15360   ;;  %v1625_v42 = vmov 3   ;;  %s1626_s10 = smov 8  }
  0x7a   : > { %1294 = vmatprep.subr.mxu0 %v1616_v0  ;;  %482 = vrot.lane.b32.xlu1 %v298_v1, %s1620_s18  ;;  %v1888_v12 = vld [vmem:[%s254_s20] sm:$0xff]  ;;  %295 = vst.msk [vmem:[#allocation4] sm:$0xff] %vm294_vm3, %v1616_v0  ;;  %vm1040_vm6 = vcmask 23552   ;;  %s1627_s6 = smov 16   ;;  %s1628_s9 = smov 24   ;;  %vm1049_vm7 = vcmask 130048  }
  0x7b   : > { %1285 = vmatpush3.msra.mxu1 %v1888_v12  ;;  %1405 = vset.pattern.permute.xlu1 %v1623_v34  ;;  %vm1051_vm8 = vcmask 195584   ;;  %s1260_s22 = sshll.u32 %s1603_s15, 7  ;;  %s286_s28 = scalar_lea.vmem [#allocation11], %s1845_s8 }
  0x7c   : > { %1282 = vmatmul.mubr.msk.f32.vlgmr.msra.gmra.mrb[0].mxu0 %vm303_vm1, %v297_v3  ;;  %1289 = vmatprep.subr.mxu1 %v1616_v0  ;;  %s1104_s30 = sshll.u32 %s286_s28, 4  ;;  %s1987_s5 = scalar_lea.hbm %s2041_s3, %s1260_s22  ;;  %s1989_s30 = int_to_ptr.vmem [resolvable:$true] %s1104_s30 }
  0x7d   : > { %1296 = vmatprep.mubr.msk.f32.mxu0 %vm1617_vm0, %v1616_v0  ;;  %s1090_s15 = scalar_lea.sflag [#allocation7], %s1842_s21  ;;  %s1525_s23 = scalar_lea.vmem %s1989_s30, 128 }
  0x7e   : > { %480 = vrot.lane.b32.xlu1 %v297_v3, %s1620_s18  ;;  %p1526_p4 = scmp.ne.s32.totalorder %s1989_s30, %s1525_s23  ;;  %p2064_p10 = scmp.ne.s32.totalorder %s2052_s25, 0 }
  0x7f   : > { %v1881_v9 = vld [vmem:[#allocation2] sm:$0xff]  ;;  %s1629_s8 = smov [#allocation11]  }
  0x80   : > { %p1527_p12 = pnand %p1526_p4, %p2064_p10  ;;  %s1529_s26 = sshll.u32 %s1629_s8, 4  ;;  %s1530_s26 = int_to_ptr.vmem [resolvable:$false] %s1529_s26 }
  0x81   : > { %s1531_s16 = scalar_lea.vmem %s1530_s26, 256  ;;  %p1532_p8 = scmp.lt.s32.totalorder %s1989_s30, %s1530_s26 }
  0x82   : > { %668 = vrot.lane.b32.xlu1 %v298_v1, %s1621_s24  ;;  %p1528_p1 = pneg %p1527_p12  ;;  %p1533_p9 = scmp.lt.s32.totalorder %s1531_s16, %s1525_s23 }
  0x84   : > { %p1534_p6 = por %p1533_p9, %p1532_p8 }
  0x86   : > { %666 = vrot.lane.b32.xlu1 %v297_v3, %s1621_s24  ;;  %p1535_p13 = pnand %p1534_p6, %p1528_p1 }
  0x8a   : > { %853 = vrot.lane.b32.xlu1 %v298_v1, %s1622_s7 }
  0x8e   : > { %851 = vrot.lane.b32.xlu1 %v297_v3, %s1622_s7 }
  0xec   : > { %v483_v13 = vpop.permute.xlu1 %482 }
  0xf0   : > { %v481_v16 = vpop.permute.xlu1 %480 }
  0xf4   : > { %v669_v18 = vpop.permute.xlu1 %668 }
  0xf8   : > { %v667_v19 = vpop.permute.xlu1 %666 }
  0xfc   : > { %v854_v21 = vpop.permute.xlu1 %853 }
 0x100   : > { %v852_v22 = vpop.permute.xlu1 %851 }
 0x14f   : > { %v376_v5 = vpop.f32.mrb[0].mxu0 }
 0x150   : > { %v1283_v6 = vpop.f32.mrb[1].mxu0  ;;  %v380_v7 = vsel %vm303_vm1, %v376_v5, -inf }
 0x151   : > { %381 = vmax.xlane.f32.xlu0 %v380_v7 }
 0x1de   : > { %v382_v10 = vpop.xlane.xlu0 %381 }
 0x1df   : > { %v1884_v11 = vmax.f32 %v1881_v9, %v382_v10 }
 0x1e1   : > { %389 = vperm.xlu0 %1404, %v1884_v11   ;;  %v384_v36 = vsub.f32 %v1881_v9, %v1884_v11 }
 0x1e3   : > { %v385_v37 = vmul.f32 1.442695, %v384_v36 }
 0x1e5   : > { %1406 = vset.pattern.permute.xlu0 %v1624_v35 }
 0x260   : > { %v390_v14 = vpop.permute.xlu0 %389 }
 0x261   : > { %v392_v15 = vsub.f32 %v376_v5, %v390_v14 }
 0x263   : > { %v393_v17 = vmul.f32 1.442695, %v392_v15 }
 0x265   : > { %1417 = vpow2.f32 %v393_v17  ;;  %v301_v17 = vld [vmem:[#allocation3] sm:$0xff] }
 0x266   : > { %1419 = vpow2.f32 %v385_v37 }
 0x26f   : > { %v1892_v20 = vpop.eup %1417 }
 0x270   : > { %1287 = vmatmul.mubr.msk.f32.vlgmr.msra.gmra.mrb[0].mxu1 %vm303_vm1, %v1892_v20  ;;  %v1932_v47 = vpop.eup %1419  ;;  %v396_v49 = vsel %vm303_vm1, %v1892_v20, 0.0 }
 0x271   : > { %1290 = vmatpush3.xpose.msk.msra.mxu1 %vm303_vm1, %v483_v13  ;;  %1291 = vmatprep.mubr.msk.f32.mxu1 %vm1617_vm0, %v1616_v0 }
 0x272   : > { %1299 = vmatprep.subr.mxu1 %v1616_v0 }
 0x274   : > { %1292 = vmatmul.mubr.msk.f32.vlgmr.msra.gmra.mrb[2].mxu1 %vm303_vm1, %v481_v16 }
 0x275   : > { %1300 = vmatpush3.xpose.msk.msra.mxu1 %vm303_vm1, %v669_v18  ;;  %1301 = vmatprep.mubr.msk.f32.mxu1 %vm1617_vm0, %v1616_v0 }
 0x276   : > { %1309 = vmatprep.subr.mxu1 %v1616_v0 }
 0x278   : > { %1302 = vmatmul.mubr.msk.f32.vlgmr.msra.gmra.mrb[4].mxu1 %vm303_vm1, %v667_v19 }
 0x279   : > { %1310 = vmatpush3.xpose.msk.msra.mxu1 %vm303_vm1, %v854_v21  ;;  %1311 = vmatprep.mubr.msk.f32.mxu1 %vm1617_vm0, %v1616_v0  ;;  %v395_v21 = vmul.f32 %v1932_v47, %v301_v17 }
 0x27c   : > { %1312 = vmatmul.mubr.msk.f32.vlgmr.msra.gmra.mrb[6].mxu1 %vm303_vm1, %v852_v22 }
 0x343   : > { %v1910_v23 = vpop.f32.mrb[0].mxu1 }
 0x344   : > { %v1288_v24 = vpop.f32.mrb[1].mxu1 }
 0x347   : > { %v554_v25 = vpop.f32.mrb[2].mxu1 }
 0x348   : > { %v1293_v26 = vpop.f32.mrb[3].mxu1  ;;  %v558_v27 = vsel %vm303_vm1, %v554_v25, -inf }
 0x349   : > { %559 = vmax.xlane.f32.xlu1 %v558_v27 }
 0x34b   : > { %v740_v28 = vpop.f32.mrb[4].mxu1 }
 0x34c   : > { %v1303_v29 = vpop.f32.mrb[5].mxu1  ;;  %v744_v30 = vsel %vm303_vm1, %v740_v28, -inf }
 0x34d   : > { %745 = vmax.xlane.f32.xlu0 %v744_v30 }
 0x34f   : > { %v925_v31 = vpop.f32.mrb[6].mxu1 }
 0x350   : > { %v1313_v32 = vpop.f32.mrb[7].mxu1  ;;  %v929_v33 = vsel %vm303_vm1, %v925_v31, -inf }
 0x351   : > { %930 = vmax.xlane.f32.xlu1 %v929_v33 }
 0x3d6   : > { %v560_v38 = vpop.xlane.xlu1 %559 }
 0x3d7   : > { %v1920_v39 = vmax.f32 %v1881_v9, %v560_v38 }
 0x3d9   : > { %567 = vperm.xlu1 %1405, %v1920_v39   ;;  %v1037_v44 = vsel %vm1036_vm4, %v1884_v11, %v1920_v39  ;;  %v562_v5 = vsub.f32 %v1881_v9, %v1920_v39 }
 0x3da   : > { %v746_v40 = vpop.xlane.xlu0 %745 }
 0x3db   : > { %v747_v41 = vmax.f32 %v1881_v9, %v746_v40  ;;  %v563_v10 = vmul.f32 1.442695, %v562_v5 }
 0x3dd   : > { %753 = vperm.xlu0 %1406, %v747_v41   ;;  %1407 = vset.pattern.permute.xlu1 %v1625_v42  ;;  %v1039_v46 = vsel %vm1038_vm5, %v1037_v44, %v747_v41  ;;  %v748_v1 = vsub.f32 %v1881_v9, %v747_v41 }
 0x3de   : > { %v931_v43 = vpop.xlane.xlu1 %930 }
 0x3df   : > { %v932_v45 = vmax.f32 %v1881_v9, %v931_v43  ;;  %v749_v6 = vmul.f32 1.442695, %v748_v1 }
 0x3e1   : > { %v1041_v48 = vsel %vm1040_vm6, %v1039_v46, %v932_v45  ;;  %1408 = vset.pattern.permute.xlu0 %v1619_v8  ;;  %938 = vperm.xlu1 %1407, %v932_v45   ;;  %v933_v11 = vsub.f32 %v1881_v9, %v932_v45 }
 0x3e2   : > { %1043 = vst.msk [vmem:[#allocation2] sm:$0xff] %vm291_vm2, %v1041_v48  ;;  %475 = vperm.xlu0 %1408, %v1932_v47   ;;  %v302_v47 = vld [vmem:[#allocation4] sm:$0xff] }
 0x3e5   : > { %579 = vrot.lane.b32.xlu1 %v1888_v12, %s1620_s18 }
 0x3e6   : > { %1410 = vset.pattern.permute.xlu0 %v1624_v35  ;;  %1409 = vset.pattern.permute.xlu1 %v1623_v34 }
 0x3e9   : > { %764 = vrot.lane.b32.xlu1 %v1888_v12, %s1621_s24 }
 0x3ed   : > { %949 = vrot.lane.b32.xlu1 %v1888_v12, %s1622_s7  ;;  %v934_v12 = vmul.f32 1.442695, %v933_v11 }
 0x411   : > { %397 = vadd.xlane.f32.xlu1 %v396_v49 }
 0x458   : > { %v568_v50 = vpop.permute.xlu1 %567 }
 0x459   : > { %v570_v51 = vsub.f32 %v554_v25, %v568_v50 }
 0x45b   : > { %v571_v52 = vmul.f32 1.442695, %v570_v51 }
 0x45c   : > { %v754_v53 = vpop.permute.xlu0 %753 }
 0x45d   : > { %1421 = vpow2.f32 %v571_v52  ;;  %v756_v54 = vsub.f32 %v740_v28, %v754_v53 }
 0x45f   : > { %v757_v55 = vmul.f32 1.442695, %v756_v54 }
 0x460   : > { %v939_v56 = vpop.permute.xlu1 %938 }
 0x461   : > { %1423 = vpow2.f32 %v757_v55  ;;  %v941_v57 = vsub.f32 %v925_v31, %v939_v56  ;;  %v476_v15 = vpop.permute.xlu0 %475 }
 0x462   : > { %v478_v50 = vmul.f32 %v476_v15, %v302_v47 }
 0x463   : > { %v942_v58 = vmul.f32 1.442695, %v941_v57 }
 0x464   : > { %v580_v59 = vpop.permute.xlu1 %579  ;;  %v479_v56 = vadd.f32 %v478_v50, %v1910_v23 }
 0x465   : > { %1425 = vpow2.f32 %v942_v58  ;;  %1295 = vmatpush3.msra.mxu0 %v580_v59 }
 0x466   : > { %1304 = vmatprep.subr.mxu0 %v1616_v0  ;;  %1427 = vpow2.f32 %v749_v6 }
 0x467   : > { %v1422_v60 = vpop.eup %1421  ;;  %1429 = vpow2.f32 %v563_v10 }
 0x468   : > { %1297 = vmatmul.mubr.msk.f32.vlgmr.msra.gmra.mrb[2].mxu0 %vm303_vm1, %v1422_v60  ;;  %v765_v61 = vpop.permute.xlu1 %764  ;;  %v574_v62 = vsel %vm303_vm1, %v1422_v60, 0.0  ;;  %1431 = vpow2.f32 %v934_v12 }
 0x469   : > { %1305 = vmatpush3.msra.mxu0 %v765_v61  ;;  %575 = vadd.xlane.f32.xlu0 %v574_v62 }
 0x46a   : > { %1306 = vmatprep.mubr.msk.f32.mxu0 %vm1617_vm0, %v1616_v0  ;;  %1314 = vmatprep.subr.mxu0 %v1616_v0 }
 0x46b   : > { %v1424_v63 = vpop.eup %1423 }
 0x46c   : > { %1307 = vmatmul.mubr.msk.f32.vlgmr.msra.gmra.mrb[4].mxu0 %vm303_vm1, %v1424_v63  ;;  %v950_v2 = vpop.permute.xlu1 %949  ;;  %v760_v3 = vsel %vm303_vm1, %v1424_v63, 0.0 }
 0x46d   : > { %1315 = vmatpush3.msra.mxu0 %v950_v2  ;;  %761 = vadd.xlane.f32.xlu1 %v760_v3 }
 0x46e   : > { %1316 = vmatprep.mubr.msk.f32.mxu0 %vm1617_vm0, %v1616_v0 }
 0x46f   : > { %v1426_v4 = vpop.eup %1425 }
 0x470   : > { %1317 = vmatmul.mubr.msk.f32.vlgmr.msra.gmra.mrb[6].mxu0 %vm303_vm1, %v1426_v4  ;;  %v945_v7 = vsel %vm303_vm1, %v1426_v4, 0.0  ;;  %v1428_v13 = vpop.eup %1427 }
 0x471   : > { %946 = vadd.xlane.f32.xlu1 %v945_v7  ;;  %v1430_v0 = vpop.eup %1429  ;;  %v759_v19 = vmul.f32 %v1428_v13, %v301_v17 }
 0x472   : > { %v1432_v14 = vpop.eup %1431  ;;  %v573_v9 = vmul.f32 %v1430_v0, %v301_v17 }
 0x473   : > { %v944_v26 = vmul.f32 %v1432_v14, %v301_v17 }
 0x47f   : > { %842 = vperm.xlu0 %1410, %v1428_v13  }
 0x482   : > { %657 = vperm.xlu1 %1409, %v1430_v0  }
 0x483   : > { %1416 = vset.pattern.permute.xlu0 %v1625_v42 }
 0x486   : > { %1411 = vset.pattern.permute.xlu1 %v1625_v42 }
 0x487   : > { %1027 = vperm.xlu1 %1411, %v1432_v14  }
 0x48b   : > { %1412 = vset.pattern.permute.xlu1 %v1619_v8 }
 0x49e   : > { %v398_v16 = vpop.xlane.xlu1 %397 }
 0x49f   : > { %v399_v25 = vadd.f32 %v398_v16, %v395_v21 }
 0x4f6   : > { %v576_v18 = vpop.xlane.xlu0 %575 }
 0x4f7   : > { %v577_v22 = vadd.f32 %v576_v18, %v573_v9 }
 0x4f9   : > { %v1044_v28 = vsel %vm1036_vm4, %v399_v25, %v577_v22 }
 0x4fa   : > { %v762_v20 = vpop.xlane.xlu1 %761 }
 0x4fb   : > { %v763_v24 = vadd.f32 %v762_v20, %v759_v19 }
 0x4fd   : > { %v1045_v30 = vsel %vm1038_vm5, %v1044_v28, %v763_v24 }
 0x4fe   : > { %v947_v27 = vpop.xlane.xlu1 %946  ;;  %v843_v49 = vpop.permute.xlu0 %842 }
 0x4ff   : > { %v948_v29 = vadd.f32 %v947_v27, %v944_v26  ;;  %v845_v52 = vmul.f32 %v843_v49, %v302_v47 }
 0x501   : > { %v1046_v8 = vsel %vm1040_vm6, %v1045_v30, %v948_v29 }
 0x502   : > { %1047 = vst.msk [vmem:[#allocation3] sm:$0xff] %vm291_vm2, %v1046_v8 }
 0x509   : > { %v1058_v31 = vld [vmem:[#allocation3] sm:$0xff] }
 0x50a   : > { %1433 = vrcp.f32 %v1058_v31 }
 0x514   : > { %v1434_v32 = vpop.eup %1433 }
 0x515   : > { %v1060_v33 = vmul.f32 %v1434_v32, %v1058_v31 }
 0x517   : > { %v1061_v36 = vsub.f32 2.0, %v1060_v33 }
 0x519   : > { %v1062_v37 = vmul.f32 %v1434_v32, %v1061_v36 }
 0x51b   : > { %1066 = vperm.xlu1 %1412, %v1062_v37  }
 0x51f   : > { %1413 = vset.pattern.permute.xlu1 %v1623_v34  ;;  %v658_v34 = vpop.permute.xlu1 %657 }
 0x520   : > { %1071 = vperm.xlu1 %1413, %v1062_v37   ;;  %v660_v51 = vmul.f32 %v658_v34, %v302_v47 }
 0x523   : > { %v1028_v45 = vpop.permute.xlu1 %1027 }
 0x524   : > { %1414 = vset.pattern.permute.xlu1 %v1624_v35  ;;  %v1030_v57 = vmul.f32 %v1028_v45, %v302_v47 }
 0x53b   : > { %v651_v38 = vpop.f32.mrb[2].mxu0 }
 0x53c   : > { %v1298_v39 = vpop.f32.mrb[3].mxu0  ;;  %662 = vrot.lane.b32.xlu1 %v651_v38, %s1626_s10 }
 0x53f   : > { %v836_v40 = vpop.f32.mrb[4].mxu0 }
 0x540   : > { %v1308_v41 = vpop.f32.mrb[5].mxu0  ;;  %847 = vrot.lane.b32.xlu1 %v836_v40, %s1627_s6 }
 0x543   : > { %v1021_v43 = vpop.f32.mrb[6].mxu0 }
 0x544   : > { %v1318_v44 = vpop.f32.mrb[7].mxu0  ;;  %1032 = vrot.lane.b32.xlu1 %v1021_v43, %s1628_s9 }
 0x548   : > { %1076 = vperm.xlu1 %1414, %v1062_v37  }
 0x54c   : > { %1415 = vset.pattern.permute.xlu1 %v1625_v42 }
 0x54d   : > { %1081 = vperm.xlu1 %1415, %v1062_v37  }
 0x59a   : > { %v1067_v46 = vpop.permute.xlu1 %1066 }
 0x59f   : > { %v1072_v35 = vpop.permute.xlu1 %1071 }
 0x5ae   : > { %v663_v48 = vpop.permute.xlu1 %662 }
 0x5af   : > { %v665_v54 = vadd.f32 %v663_v48, %v660_v51 }
 0x5b1   : > { %v1048_v58 = vsel %vm303_vm1, %v479_v56, %v665_v54 }
 0x5b2   : > { %v848_v53 = vpop.permute.xlu1 %847 }
 0x5b3   : > { %v850_v55 = vadd.f32 %v848_v53, %v845_v52 }
 0x5b5   : > { %v1050_v60 = vsel %vm1049_vm7, %v1048_v58, %v850_v55 }
 0x5b6   : > { %v1033_v42 = vpop.permute.xlu1 %1032 }
 0x5b7   : > { %v1035_v59 = vadd.f32 %v1033_v42, %v1030_v57 }
 0x5b9   : > { %v1052_v61 = vsel %vm1051_vm8, %v1050_v60, %v1035_v59 }
 0x5ba   : > { %1054 = vst.msk [vmem:[#allocation4] sm:$0xff] %vm294_vm3, %v1052_v61 }
 0x5c1   : > { %v1063_v62 = vld [vmem:[#allocation4] sm:$0xff] }
 0x5c2   : > { %v1069_v1 = vmul.f32 %v1067_v46, %v1063_v62  ;;  %v1074_v2 = vmul.f32 %v1072_v35, %v1063_v62 }
 0x5c4   : > { %v1085_v4 = vsel %vm303_vm1, %v1069_v1, %v1074_v2 }
 0x5c7   : > { %v1077_v63 = vpop.permute.xlu1 %1076 }
 0x5c8   : > { %v1079_v23 = vmul.f32 %v1077_v63, %v1063_v62 }
 0x5ca   : > { %v1086_v6 = vsel %vm1049_vm7, %v1085_v4, %v1079_v23 }
 0x5cc   : > { %v1082_v3 = vpop.permute.xlu1 %1081 }
 0x5cd   : > { %v1084_v5 = vmul.f32 %v1082_v3, %v1063_v62 }
 0x5cf   : > { %v1087_v7 = vsel %vm1051_vm8, %v1086_v6, %v1084_v5 }
 0x5d0   : > { %1088 = vst.msk [vmem:[%s286_s28] sm:$0xff] %vm294_vm3, %v1087_v7 }
 0x5d1   : > { %1538 = shalt.err (!%p1535_p13)
}
 0x5d2   : > { %s1539_s21 = scalar_lea.hbm %s1987_s5, 128  ;;  %s1543_s19 = scalar_lea.hbm %s2041_s3, 256 }
 0x5d3   : > { %p1540_p11 = scmp.ne.s32.totalorder %s1987_s5, %s1539_s21  ;;  %p1544_p7 = scmp.lt.u32.totalorder %s1987_s5, %s2041_s3 }
 0x5d4   : > { %p1545_p3 = scmp.lt.u32.totalorder %s1543_s19, %s1539_s21  ;;  %p1547_p4 = scmp.lt.u32.totalorder %s1539_s21, %s1987_s5 }
 0x5d5   : > { %p1541_p2 = pnand %p1540_p11, %p2064_p10 }
 0x5d6   : > { %p1546_p0 = por %p1545_p3, %p1544_p7 }
 0x5d7   : > { %p1542_p5 = pneg %p1541_p2 }
 0x5d8   : > { %p1548_p12 = por %p1547_p4, %p1546_p0 }
 0x5da   : > { %p1549_p1 = pnand %p1548_p12, %p1542_p5 }
 0x5dc   : > { %1552 = shalt.err (!%p1549_p1)
}
 0x5dd   : > { %1325 = dma.vmem_to_hbm [thread:$0]  (%p2064_p10), %s1989_s30, 128, %s1987_s5, %s1090_s15  }
 0x5de PF: > { %s1116_s7 = sand.u32 1, %s1591_s12   ;;  %p2065_p8 = scmp.ne.s32.totalorder %s2054_s27, 0 }
 0x5df   : > { %p2066_p9 = scmp.ge.s32.totalorder %s1611_s17, 2  ;;  %s1117_s20 = scalar_lea.sflag [#allocation7], %s1116_s7 }
 0x5e1   : > { %p1338_p6 = pnand %p2066_p9, %p2065_p8 }
 0x5e3   : > { %1586 = dma.done.wait (!%p1338_p6), %s1117_s20, 128  }
 0x5e4   : > { %1588 = vsyncadd (!%p1338_p6), %s1117_s20, 4294967168  ;;  %s22_s17 = sadd.s32 1, %s1611_s17   ;;  %s2067_s25 = sld [smem:[#allocation17_spill]] }
 0x5e5   : > { %p19_p13 = scmp.ge.s32.totalorder %s22_s17, 4   ;;  %s2068_s15 = sld [smem:[#allocation15_spill]] }
 0x5e6   : > { %s2069_s16 = sld [smem:[#allocation16_spill]]  ;;  %s2070_s12 = smov %s1595_s13 }
 0x5e7   : > { %s2071_s13 = smov %s1599_s14  ;;  %21 = sbr.rel (!%p19_p13) target bundleno = 10 (0xa), region = 109 }
 0x5ea   : > { %s2072_s14 = smov %s2067_s25 }
 0x5ee   :  { %1122 = vsyncpa [#allocation6], 1 }
 0x5ef   :  { %1124 = vsyncpa [#allocation6 + $0x1], 1 }
 0x5f0   :  { %1125 = vsyncpa [#allocation9], 1 }
 0x5f1   :  { %1127 = vsyncpa [#allocation9 + $0x1], 1 }
 0x5f2   :  { %1128 = vsyncpa [#allocation7], 1 }
 0x5f3   :  { %1130 = vsyncpa [#allocation7 + $0x1], 1 }

</bundles_post_ra>
